<compile_context>
chip_gen: v7x
topology: tpu7x:2x2x1
jax: 0.10.0
libtpu: 0.0.40
codegen_flags: <defaults>
</compile_context>

<pallas_src>
import functools

import jax
import jax.numpy as jnp
from jax import lax
from jax.experimental import pallas as pl
from jax.experimental.pallas import tpu as pltpu


def _prelu(x, a):
    # PReLU with a single shared parameter `a` (PyTorch default num_parameters=1).
    return jnp.where(x >= 0, x, a * x)


def mlp_kernel(alpha_ref,                 # SMEM (4,) f32   PReLU params
               x_ref,                     # (BN, in_ch) f32 batch-major x tile
               w0_ref, b0_ref,            # (H, in_ch) bf16, (H, 1) f32
               w1_ref, w2_ref, w3_ref,    # (H, H) bf16 each, no bias
               w4t_ref, b4_ref,           # (H, out) bf16, (1, out) f32
               o_ref):                    # (BN, out) f32   batch-major output
    # Layer 0: Linear(in_ch -> H, bias=True) + PReLU.
    # Contract in_ch of w0 with in_ch of the batch-major x tile so the result
    # is feature-major (H, BN): batch lands on lanes -> lane-dense VPU work,
    # and no wrapper-side transpose of x is ever needed.
    xb = x_ref[...].astype(jnp.bfloat16)
    h = lax.dot_general(w0_ref[...], xb,
                        dimension_numbers=(((1,), (1,)), ((), ())),
                        preferred_element_type=jnp.float32) + b0_ref[...]
    h = _prelu(h, alpha_ref[0])

    # Hidden blocks: Dropout (eval: identity) -> Linear(no bias) -> PReLU.
    for k, w_ref in enumerate((w1_ref, w2_ref, w3_ref)):
        h = jnp.dot(w_ref[...], h.astype(jnp.bfloat16),
                    preferred_element_type=jnp.float32)
        h = _prelu(h, alpha_ref[k + 1])

    # Output projection: contract H of (H, BN) with H of (H, out) -> (BN, out)
    # batch-major, stored directly (no external transpose pass over HBM).
    out = lax.dot_general(h.astype(jnp.bfloat16), w4t_ref[...],
                          dimension_numbers=(((0,), (0,)), ((), ())),
                          preferred_element_type=jnp.float32) + b4_ref[...]
    o_ref[...] = out.astype(o_ref.dtype)


@functools.partial(jax.jit, static_argnames=("block_n",))
def mlp_forward(x, params, block_n=512):
    """x: (N, in_ch) float32.  params: dict of weights (PyTorch layout)."""
    N, in_ch = x.shape
    H = params["w0"].shape[0]          # hidden_dim
    out_ch = params["w4"].shape[0]

    # Pad the batch up to a multiple of block_n (no rows silently dropped).
    n_blocks = pl.cdiv(N, block_n)
    Np = n_blocks * block_n
    x_pad = jnp.pad(x, ((0, Np - N), (0, 0))) if Np != N else x

    # Weights: PyTorch (out_features, in_features) layout, cast to bf16 for
    # the MXU.  Only w4 is (cheaply, once, tiny) pre-transposed so the final
    # dot_general contracts its leading dim.  Biases stay f32, shaped to
    # broadcast correctly against the feature-major / batch-major results.
    w0 = params["w0"].astype(jnp.bfloat16)                  # (H, in_ch)
    b0 = params["b0"].reshape(H, 1).astype(jnp.float32)     # (H, 1)
    w1 = params["w1"].astype(jnp.bfloat16)                  # (H, H)
    w2 = params["w2"].astype(jnp.bfloat16)
    w3 = params["w3"].astype(jnp.bfloat16)
    w4t = params["w4"].T.astype(jnp.bfloat16)               # (H, out_ch)
    b4 = params["b4"].reshape(1, out_ch).astype(jnp.float32)  # (1, out_ch)
    alphas = params["alphas"]                                # (4,) f32

    full = lambda shape: pl.BlockSpec(shape, lambda i: (0,) * len(shape))

    out = pl.pallas_call(
        mlp_kernel,
        out_shape=jax.ShapeDtypeStruct((Np, out_ch), jnp.float32),
        grid_spec=pltpu.PrefetchScalarGridSpec(
            num_scalar_prefetch=0,
            grid=(n_blocks,),
            in_specs=[
                pl.BlockSpec(memory_space=pltpu.MemorySpace.SMEM),  # alphas
                pl.BlockSpec((block_n, in_ch), lambda i: (i, 0)),   # x tile
                full((H, in_ch)), full((H, 1)),                     # w0, b0
                full((H, H)), full((H, H)), full((H, H)),           # w1..w3
                full((H, out_ch)), full((1, out_ch)),               # w4t, b4
            ],
            out_specs=pl.BlockSpec((block_n, out_ch), lambda i: (i, 0)),
        ),
        compiler_params=pltpu.CompilerParams(
            dimension_semantics=("parallel",)),       # megacore-friendly grid
    )(alphas, x_pad, w0, b0, w1, w2, w3, w4t, b4)

    # Strip padding; output is already batch-major (N, out_ch).
    return out[:N] if Np != N else out


def xavier_uniform(key, out_f, in_f):
    bound = jnp.sqrt(6.0 / (in_f + out_f))
    return jax.random.uniform(key, (out_f, in_f), jnp.float32, -bound, bound)


def init_params(key, in_channels, out_channel, hidden_dim):
    ks = jax.random.split(key, 8)
    # Linear weights: xavier_uniform (as in _init_parameters).
    # Biases (only first/last Linear have them): PyTorch default
    # U(-1/sqrt(fan_in), 1/sqrt(fan_in)) — deterministic via PRNGKey.
    b0_bound = 1.0 / jnp.sqrt(in_channels)
    b4_bound = 1.0 / jnp.sqrt(hidden_dim)
    return {
        "w0": xavier_uniform(ks[0], hidden_dim, in_channels),
        "b0": jax.random.uniform(ks[1], (hidden_dim,), jnp.float32,
                                 -b0_bound, b0_bound),
        "w1": xavier_uniform(ks[2], hidden_dim, hidden_dim),
        "w2": xavier_uniform(ks[3], hidden_dim, hidden_dim),
        "w3": xavier_uniform(ks[4], hidden_dim, hidden_dim),
        "w4": xavier_uniform(ks[5], out_channel, hidden_dim),
        "b4": jax.random.uniform(ks[6], (out_channel,), jnp.float32,
                                 -b4_bound, b4_bound),
        # PReLU: one shared parameter per PReLU layer, init 0.25.
        "alphas": jnp.full((4,), 0.25, jnp.float32),
    }


def mlp_reference(x, p):
    """Pure-JAX f32 reference matching PyTorch eval-mode forward."""
    a = p["alphas"]
    h = x @ p["w0"].T + p["b0"]
    h = _prelu(h, a[0])
    h = _prelu(h @ p["w1"].T, a[1])
    h = _prelu(h @ p["w2"].T, a[2])
    h = _prelu(h @ p["w3"].T, a[3])
    return h @ p["w4"].T + p["b4"]


if __name__ == "__main__":
    in_channels, out_channel, hidden_dim = 16, 8, 32
    N = 1000        # non-multiple of block_n: exercises pl.cdiv + padding path
    block_n = 512   # tuning knob: sweep 512-1024 per generation

    key = jax.random.PRNGKey(0)
    k_x, k_p = jax.random.split(key)
    x = jax.random.normal(k_x, (N, in_channels), jnp.float32)
    params = init_params(k_p, in_channels, out_channel, hidden_dim)

    out = mlp_forward(x, params, block_n=block_n)
    out = jax.block_until_ready(out)

    ref = mlp_reference(x, params)
    assert out.shape == (N, out_channel)
    # bf16 matmul operands (f32 accumulation) => loosened tolerance vs f32 ref.
    assert jnp.allclose(out, ref, atol=5e-2, rtol=5e-2), "mismatch vs reference"

    print("KERNEL_OK")
</pallas_src>

<mosaic_0001>
module attributes {stable_mosaic.version = 11 : i64} {
  func.func @mlp_kernel(%arg0: i32, %arg1: memref<4xf32, #tpu.memory_space<smem>>, %arg2: memref<512x16xf32, #tpu.memory_space<vmem>>, %arg3: memref<32x16xbf16, #tpu.memory_space<vmem>>, %arg4: memref<32x1xf32, #tpu.memory_space<vmem>>, %arg5: memref<32x32xbf16, #tpu.memory_space<vmem>>, %arg6: memref<32x32xbf16, #tpu.memory_space<vmem>>, %arg7: memref<32x32xbf16, #tpu.memory_space<vmem>>, %arg8: memref<32x8xbf16, #tpu.memory_space<vmem>>, %arg9: memref<1x8xf32, #tpu.memory_space<vmem>>, %arg10: memref<512x8xf32, #tpu.memory_space<vmem>>) attributes {dimension_semantics = [#tpu.dimension_semantics<parallel>], iteration_bounds = array<i64: 2>, scalar_prefetch = 0 : i64, scratch_operands = 0 : i64, tpu.core_type = #tpu.core_type<tc>, window_params = [{transform_indices = @transform_0, window_bounds = array<i64: 4>}, {transform_indices = @transform_1, window_bounds = array<i64: 512, 16>}, {pipeline_mode = #tpu.pipeline_mode<synchronous>, transform_indices = @transform_2, window_bounds = array<i64: 32, 16>}, {pipeline_mode = #tpu.pipeline_mode<synchronous>, transform_indices = @transform_3, window_bounds = array<i64: 32, 1>}, {pipeline_mode = #tpu.pipeline_mode<synchronous>, transform_indices = @transform_4, window_bounds = array<i64: 32, 32>}, {pipeline_mode = #tpu.pipeline_mode<synchronous>, transform_indices = @transform_5, window_bounds = array<i64: 32, 32>}, {pipeline_mode = #tpu.pipeline_mode<synchronous>, transform_indices = @transform_6, window_bounds = array<i64: 32, 32>}, {pipeline_mode = #tpu.pipeline_mode<synchronous>, transform_indices = @transform_7, window_bounds = array<i64: 32, 8>}, {pipeline_mode = #tpu.pipeline_mode<synchronous>, transform_indices = @transform_8, window_bounds = array<i64: 1, 8>}, {transform_indices = @transform_9, window_bounds = array<i64: 512, 8>}]} {
    %c0 = arith.constant 0 : index
    %c0_0 = arith.constant 0 : index
    %0 = vector.load %arg2[%c0, %c0_0] : memref<512x16xf32, #tpu.memory_space<vmem>>, vector<512x16xf32>
    %1 = arith.truncf %0 : vector<512x16xf32> to vector<512x16xbf16>
    %c0_1 = arith.constant 0 : index
    %c0_2 = arith.constant 0 : index
    %2 = vector.load %arg3[%c0_1, %c0_2] : memref<32x16xbf16, #tpu.memory_space<vmem>>, vector<32x16xbf16>
    %cst = arith.constant dense<0.000000e+00> : vector<32x512xf32>
    %3 = tpu.matmul %2, %1, %cst {dimension_numbers = #tpu.dot_dimension_numbers<[1], [1], [0], [0], [0, 0, 1, 0], [], []>} : vector<32x16xbf16>, vector<512x16xbf16>, vector<32x512xf32> -> vector<32x512xf32>
    %c0_3 = arith.constant 0 : index
    %c0_4 = arith.constant 0 : index
    %4 = vector.load %arg4[%c0_3, %c0_4] : memref<32x1xf32, #tpu.memory_space<vmem>>, vector<32x1xf32>
    %5 = vector.broadcast %4 : vector<32x1xf32> to vector<32x512xf32>
    %6 = arith.addf %3, %5 : vector<32x512xf32>
    %c0_5 = arith.constant 0 : index
    %7 = memref.load %arg1[%c0_5] : memref<4xf32, #tpu.memory_space<smem>>
    %cst_6 = arith.constant 0.000000e+00 : f32
    %8 = vector.broadcast %cst_6 : f32 to vector<32x512xf32>
    %9 = arith.cmpf oge, %6, %8 : vector<32x512xf32>
    %10 = vector.broadcast %7 : f32 to vector<32x512xf32>
    %11 = arith.mulf %10, %6 : vector<32x512xf32>
    %12 = arith.select %9, %6, %11 : vector<32x512xi1>, vector<32x512xf32>
    %c0_7 = arith.constant 0 : index
    %c0_8 = arith.constant 0 : index
    %13 = vector.load %arg5[%c0_7, %c0_8] : memref<32x32xbf16, #tpu.memory_space<vmem>>, vector<32x32xbf16>
    %14 = arith.truncf %12 : vector<32x512xf32> to vector<32x512xbf16>
    %cst_9 = arith.constant dense<0.000000e+00> : vector<32x512xf32>
    %15 = tpu.matmul %13, %14, %cst_9 {dimension_numbers = #tpu.dot_dimension_numbers<[1], [0], [0], [1], [0, 0, 1, 1], [], []>} : vector<32x32xbf16>, vector<32x512xbf16>, vector<32x512xf32> -> vector<32x512xf32>
    %c1 = arith.constant 1 : index
    %16 = memref.load %arg1[%c1] : memref<4xf32, #tpu.memory_space<smem>>
    %cst_10 = arith.constant 0.000000e+00 : f32
    %17 = vector.broadcast %cst_10 : f32 to vector<32x512xf32>
    %18 = arith.cmpf oge, %15, %17 : vector<32x512xf32>
    %19 = vector.broadcast %16 : f32 to vector<32x512xf32>
    %20 = arith.mulf %19, %15 : vector<32x512xf32>
    %21 = arith.select %18, %15, %20 : vector<32x512xi1>, vector<32x512xf32>
    %c0_11 = arith.constant 0 : index
    %c0_12 = arith.constant 0 : index
    %22 = vector.load %arg6[%c0_11, %c0_12] : memref<32x32xbf16, #tpu.memory_space<vmem>>, vector<32x32xbf16>
    %23 = arith.truncf %21 : vector<32x512xf32> to vector<32x512xbf16>
    %cst_13 = arith.constant dense<0.000000e+00> : vector<32x512xf32>
    %24 = tpu.matmul %22, %23, %cst_13 {dimension_numbers = #tpu.dot_dimension_numbers<[1], [0], [0], [1], [0, 0, 1, 1], [], []>} : vector<32x32xbf16>, vector<32x512xbf16>, vector<32x512xf32> -> vector<32x512xf32>
    %c2 = arith.constant 2 : index
    %25 = memref.load %arg1[%c2] : memref<4xf32, #tpu.memory_space<smem>>
    %cst_14 = arith.constant 0.000000e+00 : f32
    %26 = vector.broadcast %cst_14 : f32 to vector<32x512xf32>
    %27 = arith.cmpf oge, %24, %26 : vector<32x512xf32>
    %28 = vector.broadcast %25 : f32 to vector<32x512xf32>
    %29 = arith.mulf %28, %24 : vector<32x512xf32>
    %30 = arith.select %27, %24, %29 : vector<32x512xi1>, vector<32x512xf32>
    %c0_15 = arith.constant 0 : index
    %c0_16 = arith.constant 0 : index
    %31 = vector.load %arg7[%c0_15, %c0_16] : memref<32x32xbf16, #tpu.memory_space<vmem>>, vector<32x32xbf16>
    %32 = arith.truncf %30 : vector<32x512xf32> to vector<32x512xbf16>
    %cst_17 = arith.constant dense<0.000000e+00> : vector<32x512xf32>
    %33 = tpu.matmul %31, %32, %cst_17 {dimension_numbers = #tpu.dot_dimension_numbers<[1], [0], [0], [1], [0, 0, 1, 1], [], []>} : vector<32x32xbf16>, vector<32x512xbf16>, vector<32x512xf32> -> vector<32x512xf32>
    %c3 = arith.constant 3 : index
    %34 = memref.load %arg1[%c3] : memref<4xf32, #tpu.memory_space<smem>>
    %cst_18 = arith.constant 0.000000e+00 : f32
    %35 = vector.broadcast %cst_18 : f32 to vector<32x512xf32>
    %36 = arith.cmpf oge, %33, %35 : vector<32x512xf32>
    %37 = vector.broadcast %34 : f32 to vector<32x512xf32>
    %38 = arith.mulf %37, %33 : vector<32x512xf32>
    %39 = arith.select %36, %33, %38 : vector<32x512xi1>, vector<32x512xf32>
    %40 = arith.truncf %39 : vector<32x512xf32> to vector<32x512xbf16>
    %c0_19 = arith.constant 0 : index
    %c0_20 = arith.constant 0 : index
    %41 = vector.load %arg8[%c0_19, %c0_20] : memref<32x8xbf16, #tpu.memory_space<vmem>>, vector<32x8xbf16>
    %cst_21 = arith.constant dense<0.000000e+00> : vector<512x8xf32>
    %42 = tpu.matmul %40, %41, %cst_21 {dimension_numbers = #tpu.dot_dimension_numbers<[0], [0], [1], [1], [0, 1, 1, 1], [], []>} : vector<32x512xbf16>, vector<32x8xbf16>, vector<512x8xf32> -> vector<512x8xf32>
    %c0_22 = arith.constant 0 : index
    %c0_23 = arith.constant 0 : index
    %43 = vector.load %arg9[%c0_22, %c0_23] : memref<1x8xf32, #tpu.memory_space<vmem>>, vector<1x8xf32>
    %44 = vector.broadcast %43 : vector<1x8xf32> to vector<512x8xf32>
    %45 = arith.addf %42, %44 : vector<512x8xf32>
    %c0_24 = arith.constant 0 : index
    %c0_25 = arith.constant 0 : index
    %46 = vector.load %arg10[%c0_24, %c0_25] : memref<512x8xf32, #tpu.memory_space<vmem>>, vector<512x8xf32>
    tpu.vector_store %arg10[%c0_24, %c0_25], %45 {strides = array<i32>} : memref<512x8xf32, #tpu.memory_space<vmem>>, vector<512x8xf32>,
    return
  }
  func.func @transform_0(%arg0: i32) -> i32 {
    %c0_i32 = arith.constant 0 : i32
    %c0_i32_0 = arith.constant 0 : i32
    return %c0_i32 : i32
  }
  func.func @transform_1(%arg0: i32) -> (i32, i32) {
    %c0_i32 = arith.constant 0 : i32
    %c0_i32_0 = arith.constant 0 : i32
    return %arg0, %c0_i32 : i32, i32
  }
  func.func @transform_2(%arg0: i32) -> (i32, i32) {
    %c0_i32 = arith.constant 0 : i32
    %c0_i32_0 = arith.constant 0 : i32
    %c0_i32_1 = arith.constant 0 : i32
    return %c0_i32, %c0_i32_0 : i32, i32
  }
  func.func @transform_3(%arg0: i32) -> (i32, i32) {
    %c0_i32 = arith.constant 0 : i32
    %c0_i32_0 = arith.constant 0 : i32
    %c0_i32_1 = arith.constant 0 : i32
    return %c0_i32, %c0_i32_0 : i32, i32
  }
  func.func @transform_4(%arg0: i32) -> (i32, i32) {
    %c0_i32 = arith.constant 0 : i32
    %c0_i32_0 = arith.constant 0 : i32
    %c0_i32_1 = arith.constant 0 : i32
    return %c0_i32, %c0_i32_0 : i32, i32
  }
  func.func @transform_5(%arg0: i32) -> (i32, i32) {
    %c0_i32 = arith.constant 0 : i32
    %c0_i32_0 = arith.constant 0 : i32
    %c0_i32_1 = arith.constant 0 : i32
    return %c0_i32, %c0_i32_0 : i32, i32
  }
  func.func @transform_6(%arg0: i32) -> (i32, i32) {
    %c0_i32 = arith.constant 0 : i32
    %c0_i32_0 = arith.constant 0 : i32
    %c0_i32_1 = arith.constant 0 : i32
    return %c0_i32, %c0_i32_0 : i32, i32
  }
  func.func @transform_7(%arg0: i32) -> (i32, i32) {
    %c0_i32 = arith.constant 0 : i32
    %c0_i32_0 = arith.constant 0 : i32
    %c0_i32_1 = arith.constant 0 : i32
    return %c0_i32, %c0_i32_0 : i32, i32
  }
  func.func @transform_8(%arg0: i32) -> (i32, i32) {
    %c0_i32 = arith.constant 0 : i32
    %c0_i32_0 = arith.constant 0 : i32
    %c0_i32_1 = arith.constant 0 : i32
    return %c0_i32, %c0_i32_0 : i32, i32
  }
  func.func @transform_9(%arg0: i32) -> (i32, i32) {
    %c0_i32 = arith.constant 0 : i32
    %c0_i32_0 = arith.constant 0 : i32
    return %arg0, %c0_i32 : i32, i32
  }
}

</mosaic_0001>

<bundles_post_ra>
// kernel: mlp_forward.1
= control target key start
LH: loop header
LB: loop body
LE: loop exit
PB: predicated region body
PF: predicated region fallthrough
CT: control target
= control target key end

     0   :  { %14 = vsyncpa [#allocation3], 0  ;;  %s2254_s30 = smov 0   ;;  %s2812_s0 = inlined_call_operand.vmem [shape: f32[4], index: 0, kind: input, shape index: {}]   ;;  %s2813_s1 = inlined_call_operand.vmem [shape: f32[1024,16], index: 1, kind: input, shape index: {}]   ;;  %s2814_s2 = inlined_call_operand.vmem [shape: bf16[32,16], index: 2, kind: input, shape index: {}]   ;;  %s2815_s3 = inlined_call_operand.vmem [shape: f32[32,1], index: 3, kind: input, shape index: {}]   ;;  %s2816_s4 = inlined_call_operand.vmem [shape: bf16[32,32], index: 4, kind: input, shape index: {}]   ;;  %s2817_s5 = inlined_call_operand.vmem [shape: bf16[32,32], index: 5, kind: input, shape index: {}]   ;;  %s2818_s6 = inlined_call_operand.vmem [shape: bf16[32,32], index: 6, kind: input, shape index: {}]   ;;  %s2819_s7 = inlined_call_operand.vmem [shape: bf16[32,8], index: 7, kind: input, shape index: {}]   ;;  %s2820_s8 = inlined_call_operand.vmem [shape: f32[1,8], index: 8, kind: input, shape index: {}]   ;;  %s2821_s9 = inlined_call_operand.vmem [shape: f32[1024,8], index: 9, kind: output, shape index: {}]  }
   0x1 LB: > { %s1910_s10 = sadd.s32 4294967295, %s2200_s30   ;;  %p1912_p0 = scmp.ge.s32.totalorder %s2200_s30, 1  ;;  %s2200_s30 = sphi %s2254_s30, %s20_s30  }
   0x2   : > { %p245_p1 = scmp.lt.s32.totalorder %s2200_s30, 3  ;;  %s258_s13 = sshll.u32 %s2812_s0, 4  ;;  %s259_s13 = int_to_ptr.vmem [resolvable:$true] %s258_s13 }
   0x3   : > { %p2269_p3 = scmp.eq.s32.totalorder %s1910_s10, 0  ;;  %s2175_s16 = scalar_lea.vmem %s259_s13, 16 }
   0x4   : > { %p2265_p2 = pnand %p1912_p0, %p245_p1  ;;  %p2176_p6 = scmp.ne.s32.totalorder %s259_s13, %s2175_s16 }
   0x5   : > { %p2183_p10 = scmp.lt.s32.totalorder %s259_s13, %s259_s13  ;;  %p2184_p11 = scmp.lt.s32.totalorder %s2175_s16, %s2175_s16 }
   0x6   : > { %p2147_p4 = pneg %p2265_p2 }
   0x7   : > { %p2185_p12 = por %p2184_p11, %p2183_p10 }
   0x8   : > { %p2148_p5 = pnand %p2269_p3, %p2147_p4 }
   0xa   : > { %p2177_p7 = pneg %p2148_p5 }
   0xc   : > { %p2178_p8 = pnand %p2177_p7, %p2176_p6 }
   0xe   : > { %p2179_p9 = pneg %p2178_p8 }
  0x10   : > { %p2186_p13 = pnand %p2185_p12, %p2179_p9 }
  0x12   : > { %2189 = shalt.err (!%p2186_p13)
}
  0x13   : > { %s2202_s17 = smov [#allocation2]   ;;  %301 = sbr.rel (%p2265_p2) target bundleno = 1469 (0x5bd), region = 56 }
  0x14   : > { %2150 = dma.vmem_to_smem (!%p2148_p5), %s259_s13, 16, %s2202_s17, [#allocation3]  }
  0x1a   : > { %2195 = dma.done.wait (%p2269_p3), [#allocation3], 16  }
  0x1b   : > { %2197 = vsyncadd (%p2269_p3), [#allocation3], 4294967280 }
  0x1c   : > { %307 = sfence }
  0x1d   : > { %s1917_s18 = sshll.u32 %s1910_s10, 6  ;;  %v2286_v0 = vld [vmem:[%s2814_s2] sm:$0xff]   ;;  %vm485_vm0 = vcmask 130048   ;;  %v2203_v20 = vmov 0   ;;  %v452_v32 = vld [vmem:[%s2815_s3 + $0x8] sm:$0xff]  ;;  %v453_v33 = vld [vmem:[%s2815_s3 + $0x10] sm:$0xff] }
  0x1e   : > { %p339_p0 = scmp.lt.s32.totalorder %s1917_s18, 127  ;;  %2001 = vmatprep.mubr.msk.bf16.mxu1 %vm485_vm0, %v2286_v0  ;;  %2163 = vset.pattern.permute.xlu0 %v2203_v20  ;;  %v451_v30 = vld [vmem:[%s2815_s3] sm:$0xff]  ;;  %v454_v34 = vld [vmem:[%s2815_s3 + $0x18] sm:$0xff]  ;;  %s694_s15 = sld [smem:[#allocation2]]  ;;  %vm766_vm9 = vcmask 261120  }
  0x1f   : > { %2164 = vset.pattern.permute.xlu1 %v2203_v20  ;;  %805 = vmatprep.mubr.bf16.mxu0 %v2203_v20  ;;  %s1933_s22 = sld [smem:[#allocation2 + $0x1]]  ;;  %s1940_s27 = sld [smem:[#allocation2 + $0x2]] }
  0x20   : > { %s2825_s18 = smov (!%p339_p0, %s1917_s18), 127  ;;  %457 = vperm.xlu0 %2163, %v451_v30   ;;  %467 = vperm.xlu1 %2164, %v453_v33   ;;  %s1947_s16 = sld [smem:[#allocation2 + $0x3]] }
  0x21   : > { %s1918_s21 = sshll.u32 %s2825_s18, 3 }
  0x22   : > { %s2298_s24 = scalar_lea.vmem %s2813_s1, %s1918_s21  ;;  %s2615_s23 = scalar_lea.vmem %s2821_s9, %s1918_s21 }
  0x23   : > { %v367_v1 = vld [vmem:[%s2298_s24 + $0x80] sm:$0xff]  ;;  %v368_v2 = vld [vmem:[%s2298_s24 + $0x88] sm:$0xff]  ;;  %v369_v6 = vld [vmem:[%s2298_s24 + $0x90] sm:$0xff] }
  0x24   : > { %v351_v3 = vld [vmem:[%s2298_s24] sm:$0xff]  ;;  %v423_v4 = vpack.c.bf16 %v368_v2, %v367_v1  ;;  %v352_v5 = vld [vmem:[%s2298_s24 + $0x8] sm:$0xff]  ;;  %v370_v7 = vld [vmem:[%s2298_s24 + $0x98] sm:$0xff]  ;;  %462 = vperm.xlu0 %2163, %v452_v32   ;;  %472 = vperm.xlu1 %2164, %v454_v34  }
  0x25   : > { %v415_v8 = vpack.c.bf16 %v352_v5, %v351_v3  ;;  %v424_v9 = vpack.c.bf16 %v370_v7, %v369_v6  ;;  %v353_v10 = vld [vmem:[%s2298_s24 + $0x10] sm:$0xff]  ;;  %v354_v11 = vld [vmem:[%s2298_s24 + $0x18] sm:$0xff]  ;;  %v371_v14 = vld [vmem:[%s2298_s24 + $0xa0] sm:$0xff] }
  0x26   : > { %2127 = vmatprep.subr.msk.bf16.mxu1 %vm485_vm0, %v423_v4  ;;  %v416_v13 = vpack.c.bf16 %v354_v11, %v353_v10  ;;  %v372_v15 = vld [vmem:[%s2298_s24 + $0xa8] sm:$0xff]  ;;  %v355_v18 = vld [vmem:[%s2298_s24 + $0x20] sm:$0xff]  ;;  %v373_v22 = vld [vmem:[%s2298_s24 + $0xb0] sm:$0xff] }
  0x27   : > { %v493_v12 = vsel %vm485_vm0, %v415_v8, 0  ;;  %v425_v17 = vpack.c.bf16 %v372_v15, %v371_v14  ;;  %v356_v19 = vld [vmem:[%s2298_s24 + $0x28] sm:$0xff]  ;;  %v374_v23 = vld [vmem:[%s2298_s24 + $0xb8] sm:$0xff]  ;;  %v357_v26 = vld [vmem:[%s2298_s24 + $0x30] sm:$0xff] }
  0x28   : > { %1986 = vmatpush3.bf16.xpose.msra.mxu1 %v493_v12  ;;  %v496_v16 = vsel %vm485_vm0, %v416_v13, 0  ;;  %v417_v21 = vpack.c.bf16 %v356_v19, %v355_v18  ;;  %v426_v25 = vpack.c.bf16 %v374_v23, %v373_v22  ;;  %v358_v27 = vld [vmem:[%s2298_s24 + $0x38] sm:$0xff]  ;;  %v375_v28 = vld [vmem:[%s2298_s24 + $0xc0] sm:$0xff]  ;;  %v376_v29 = vld [vmem:[%s2298_s24 + $0xc8] sm:$0xff] }
  0x29   : > { %2128 = vmatprep.subr.msk.bf16.mxu1 %vm485_vm0, %v424_v9  ;;  %v418_v31 = vpack.c.bf16 %v358_v27, %v357_v26  ;;  %v427_v36 = vpack.c.bf16 %v376_v29, %v375_v28  ;;  %v359_v37 = vld [vmem:[%s2298_s24 + $0x40] sm:$0xff]  ;;  %v360_v38 = vld [vmem:[%s2298_s24 + $0x48] sm:$0xff]  ;;  %v377_v40 = vld [vmem:[%s2298_s24 + $0xd0] sm:$0xff] }
  0x2a   : > { %v499_v24 = vsel %vm485_vm0, %v417_v21, 0  ;;  %v419_v39 = vpack.c.bf16 %v360_v38, %v359_v37  ;;  %v378_v41 = vld [vmem:[%s2298_s24 + $0xd8] sm:$0xff]  ;;  %v361_v44 = vld [vmem:[%s2298_s24 + $0x50] sm:$0xff]  ;;  %v379_v47 = vld [vmem:[%s2298_s24 + $0xe0] sm:$0xff] }
  0x2b   : > { %v502_v35 = vsel %vm485_vm0, %v418_v31, 0  ;;  %v428_v43 = vpack.c.bf16 %v378_v41, %v377_v40  ;;  %v362_v45 = vld [vmem:[%s2298_s24 + $0x58] sm:$0xff]  ;;  %v380_v48 = vld [vmem:[%s2298_s24 + $0xe8] sm:$0xff]  ;;  %v363_v51 = vld [vmem:[%s2298_s24 + $0x60] sm:$0xff] }
  0x2c   : > { %v505_v42 = vsel %vm485_vm0, %v419_v39, 0  ;;  %v420_v46 = vpack.c.bf16 %v362_v45, %v361_v44  ;;  %v429_v50 = vpack.c.bf16 %v380_v48, %v379_v47  ;;  %v364_v52 = vld [vmem:[%s2298_s24 + $0x68] sm:$0xff]  ;;  %v381_v54 = vld [vmem:[%s2298_s24 + $0xf0] sm:$0xff]  ;;  %v382_v55 = vld [vmem:[%s2298_s24 + $0xf8] sm:$0xff] }
  0x2d   : > { %v421_v53 = vpack.c.bf16 %v364_v52, %v363_v51  ;;  %v430_v57 = vpack.c.bf16 %v382_v55, %v381_v54  ;;  %v365_v58 = vld [vmem:[%s2298_s24 + $0x70] sm:$0xff]  ;;  %v366_v59 = vld [vmem:[%s2298_s24 + $0x78] sm:$0xff]  ;;  %v399_v61 = vld [vmem:[%s2298_s24 + $0x180] sm:$0xff] }
  0x2e   : > { %v508_v49 = vsel %vm485_vm0, %v420_v46, 0  ;;  %v422_v60 = vpack.c.bf16 %v366_v59, %v365_v58  ;;  %v400_v62 = vld [vmem:[%s2298_s24 + $0x188] sm:$0xff]  ;;  %v383_v2 = vld [vmem:[%s2298_s24 + $0x100] sm:$0xff]  ;;  %v401_v5 = vld [vmem:[%s2298_s24 + $0x190] sm:$0xff]  ;;  %v2433_v59 = vstv %s694_s15 }
  0x2f   : > { %v511_v56 = vsel %vm485_vm0, %v421_v53, 0  ;;  %v439_v1 = vpack.c.bf16 %v400_v62, %v399_v61  ;;  %v384_v3 = vld [vmem:[%s2298_s24 + $0x108] sm:$0xff]  ;;  %v402_v6 = vld [vmem:[%s2298_s24 + $0x198] sm:$0xff]  ;;  %v385_v10 = vld [vmem:[%s2298_s24 + $0x110] sm:$0xff] }
  0x30   : > { %1988 = vmatpush3.bf16.xpose.msra.mxu1 %v496_v16  ;;  %v514_v63 = vsel %vm485_vm0, %v422_v60, 0  ;;  %v431_v4 = vpack.c.bf16 %v384_v3, %v383_v2  ;;  %v2373_v7 = vld [vmem:[%s2814_s2 + $0x8] sm:$0xff]   ;;  %v440_v9 = vpack.c.bf16 %v402_v6, %v401_v5  ;;  %v386_v11 = vld [vmem:[%s2298_s24 + $0x118] sm:$0xff]  ;;  %v403_v13 = vld [vmem:[%s2298_s24 + $0x1a0] sm:$0xff] }
  0x31   : > { %2129 = vmatprep.subr.msk.bf16.mxu1 %vm485_vm0, %v425_v17  ;;  %v432_v12 = vpack.c.bf16 %v386_v11, %v385_v10  ;;  %v404_v14 = vld [vmem:[%s2298_s24 + $0x1a8] sm:$0xff]  ;;  %v387_v17 = vld [vmem:[%s2298_s24 + $0x120] sm:$0xff]  ;;  %v405_v21 = vld [vmem:[%s2298_s24 + $0x1b0] sm:$0xff] }
  0x32   : > { %v541_v8 = vsel %vm485_vm0, %v431_v4, 0  ;;  %v441_v16 = vpack.c.bf16 %v404_v14, %v403_v13  ;;  %v388_v18 = vld [vmem:[%s2298_s24 + $0x128] sm:$0xff]  ;;  %v406_v22 = vld [vmem:[%s2298_s24 + $0x1b8] sm:$0xff]  ;;  %v407_v28 = vld [vmem:[%s2298_s24 + $0x1c0] sm:$0xff] }
  0x33   : > { %v544_v15 = vsel %vm485_vm0, %v432_v12, 0  ;;  %v433_v19 = vpack.c.bf16 %v388_v18, %v387_v17  ;;  %v390_v26 = vld [vmem:[%s2298_s24 + $0x138] sm:$0xff]  ;;  %v408_v29 = vld [vmem:[%s2298_s24 + $0x1c8] sm:$0xff]  ;;  %v391_v32 = vld [vmem:[%s2298_s24 + $0x140] sm:$0xff] }
  0x34   : > { %v443_v31 = vpack.c.bf16 %v408_v29, %v407_v28  ;;  %v392_v33 = vld [vmem:[%s2298_s24 + $0x148] sm:$0xff]  ;;  %v393_v39 = vld [vmem:[%s2298_s24 + $0x150] sm:$0xff]  ;;  %v394_v40 = vld [vmem:[%s2298_s24 + $0x158] sm:$0xff] }
  0x35   : > { %v547_v23 = vsel %vm485_vm0, %v433_v19, 0  ;;  %v435_v34 = vpack.c.bf16 %v392_v33, %v391_v32  ;;  %v436_v41 = vpack.c.bf16 %v394_v40, %v393_v39  ;;  %v395_v46 = vld [vmem:[%s2298_s24 + $0x160] sm:$0xff]  ;;  %v396_v47 = vld [vmem:[%s2298_s24 + $0x168] sm:$0xff]  ;;  %v397_v53 = vld [vmem:[%s2298_s24 + $0x170] sm:$0xff] }
  0x36   : > { %v437_v48 = vpack.c.bf16 %v396_v47, %v395_v46  ;;  %v398_v54 = vld [vmem:[%s2298_s24 + $0x178] sm:$0xff] }
  0x37   : > { %v553_v37 = vsel %vm485_vm0, %v435_v34, 0  ;;  %v556_v44 = vsel %vm485_vm0, %v436_v41, 0  ;;  %v438_v55 = vpack.c.bf16 %v398_v54, %v397_v53 }
  0x38   : > { %1990 = vmatpush3.bf16.xpose.msra.mxu1 %v499_v24  ;;  %v442_v24 = vpack.c.bf16 %v406_v22, %v405_v21  ;;  %v559_v51 = vsel %vm485_vm0, %v437_v48, 0 }
  0x39   : > { %2130 = vmatprep.subr.msk.bf16.mxu1 %vm485_vm0, %v426_v25  ;;  %v389_v25 = vld [vmem:[%s2298_s24 + $0x130] sm:$0xff] }
  0x3a   : > { %v434_v27 = vpack.c.bf16 %v390_v26, %v389_v25 }
  0x3c   : > { %v550_v30 = vsel %vm485_vm0, %v434_v27, 0 }
  0x40   : > { %1992 = vmatpush3.bf16.xpose.msra.mxu1 %v502_v35  ;;  %v409_v35 = vld [vmem:[%s2298_s24 + $0x1d0] sm:$0xff] }
  0x41   : > { %2131 = vmatprep.subr.msk.bf16.mxu1 %vm485_vm0, %v427_v36  ;;  %v410_v36 = vld [vmem:[%s2298_s24 + $0x1d8] sm:$0xff] }
  0x42   : > { %v444_v38 = vpack.c.bf16 %v410_v36, %v409_v35  ;;  %v2167_v35 = vld [vmem:[%s2816_s4] sm:$0xff]   ;;  %v2168_v36 = vld [vmem:[%s2816_s4 + $0x8] sm:$0xff]  }
  0x48   : > { %1994 = vmatpush3.bf16.xpose.msra.mxu1 %v505_v42  ;;  %v411_v42 = vld [vmem:[%s2298_s24 + $0x1e0] sm:$0xff] }
  0x49   : > { %2132 = vmatprep.subr.msk.bf16.mxu1 %vm485_vm0, %v428_v43  ;;  %v412_v43 = vld [vmem:[%s2298_s24 + $0x1e8] sm:$0xff] }
  0x4a   : > { %v445_v45 = vpack.c.bf16 %v412_v43, %v411_v42 }
  0x50   : > { %1996 = vmatpush3.bf16.xpose.msra.mxu1 %v508_v49  ;;  %v413_v49 = vld [vmem:[%s2298_s24 + $0x1f0] sm:$0xff] }
  0x51   : > { %2133 = vmatprep.subr.msk.bf16.mxu1 %vm485_vm0, %v429_v50  ;;  %v414_v50 = vld [vmem:[%s2298_s24 + $0x1f8] sm:$0xff] }
  0x52   : > { %v446_v52 = vpack.c.bf16 %v414_v50, %v413_v49 }
  0x58   : > { %1998 = vmatpush3.bf16.xpose.msra.mxu1 %v511_v56  ;;  %v562_v56 = vsel %vm485_vm0, %v438_v55, 0 }
  0x59   : > { %2134 = vmatprep.subr.msk.bf16.mxu1 %vm485_vm0, %v430_v57 }
  0x60   : > { %2000 = vmatpush3.bf16.xpose.msra.mxu1 %v514_v63 }
  0x61   : > { %2135 = vmatprep.subr.msk.bf16.mxu1 %vm485_vm0, %v439_v1 }
  0x67   : > { %2002 = vmatmul.mubr.msk.bf16.vlgmr.msra.gmra.mrb[0].mxu1 %vm485_vm0, %v2286_v0 }
  0x68   : > { %2006 = vmatpush3.bf16.xpose.msra.mxu1 %v541_v8  ;;  %2003 = vmatprep.mubr.msk.bf16.mxu1 %vm485_vm0, %v2373_v7 }
  0x69   : > { %2136 = vmatprep.subr.msk.bf16.mxu1 %vm485_vm0, %v440_v9 }
  0x6f   : > { %2004 = vmatmul.mubr.msk.bf16.gmra.mrb[4].mxu1 %vm485_vm0, %v2373_v7 }
  0x70   : > { %2008 = vmatpush3.bf16.xpose.msra.mxu1 %v544_v15  ;;  %2021 = vmatprep.mubr.msk.bf16.mxu1 %vm485_vm0, %v2286_v0 }
  0x71   : > { %2137 = vmatprep.subr.msk.bf16.mxu1 %vm485_vm0, %v441_v16 }
  0x78   : > { %2010 = vmatpush3.bf16.xpose.msra.mxu1 %v547_v23 }
  0x79   : > { %2138 = vmatprep.subr.msk.bf16.mxu1 %vm485_vm0, %v442_v24 }
  0x80   : > { %2012 = vmatpush3.bf16.xpose.msra.mxu1 %v550_v30 }
  0x81   : > { %2139 = vmatprep.subr.msk.bf16.mxu1 %vm485_vm0, %v443_v31 }
  0x88   : > { %2014 = vmatpush3.bf16.xpose.msra.mxu1 %v553_v37 }
  0x89   : > { %2140 = vmatprep.subr.msk.bf16.mxu1 %vm485_vm0, %v444_v38 }
  0x90   : > { %2016 = vmatpush3.bf16.xpose.msra.mxu1 %v556_v44 }
  0x91   : > { %2141 = vmatprep.subr.msk.bf16.mxu1 %vm485_vm0, %v445_v45 }
  0x98   : > { %2018 = vmatpush3.bf16.xpose.msra.mxu1 %v559_v51 }
  0x99   : > { %2142 = vmatprep.subr.msk.bf16.mxu1 %vm485_vm0, %v446_v52 }
  0x9f   : > { %v2431_v57 = vpop.permute.xlu0 %457  ;;  %v2442_v5 = vpop.permute.xlu1 %467 }
  0xa0   : > { %2020 = vmatpush3.bf16.xpose.msra.mxu1 %v562_v56 }
  0xa3   : > { %v2435_v60 = vpop.permute.xlu0 %462  ;;  %v2448_v18 = vpop.permute.xlu1 %472 }
  0xa7   : > { %2022 = vmatmul.mubr.msk.bf16.vlgmr.msra.gmra.mrb[8].mxu1 %vm485_vm0, %v2286_v0 }
  0xa8   : > { %2023 = vmatprep.mubr.msk.bf16.mxu1 %vm485_vm0, %v2373_v7 }
  0xaf   : > { %2024 = vmatmul.mubr.msk.bf16.gmra.mrb[12].mxu1 %vm485_vm0, %v2373_v7 }
  0xb0   : > { %858 = vmatprep.mubr.bf16.mxu1 %v2203_v20 }
 0x13a   : > { %v622_v58 = vpop.f32.mrb[0].mxu1 }
 0x13b   : > { %v623_v61 = vadd.f32 %v622_v58, %v2431_v57  ;;  %v624_v62 = vpop.f32.mrb[1].mxu1 }
 0x13c   : > { %v625_v0 = vadd.f32 %v624_v62, %v2431_v57  ;;  %v626_v63 = vpop.f32.mrb[2].mxu1 }
 0x13d   : > { %v712_v1 = vmul.f32 %v2433_v59, %v623_v61  ;;  %v627_v2 = vadd.f32 %v626_v63, %v2435_v60  ;;  %v628_v3 = vpop.f32.mrb[3].mxu1  ;;  %vm695_vm1 = vcmp.ge.f32.partialorder %v623_v61, 0.0 }
 0x13e   : > { %v713_v4 = vmul.f32 %v2433_v59, %v625_v0  ;;  %v629_v6 = vadd.f32 %v628_v3, %v2435_v60  ;;  %vm696_vm2 = vcmp.ge.f32.partialorder %v625_v0, 0.0 }
 0x13f   : > { %v716_v7 = vmul.f32 %v2433_v59, %v627_v2  ;;  %vm699_vm3 = vcmp.ge.f32.partialorder %v627_v2, 0.0  ;;  %v728_v9 = vsel %vm695_vm1, %v623_v61, %v712_v1 }
 0x140   : > { %v717_v8 = vmul.f32 %v2433_v59, %v629_v6  ;;  %vm700_vm4 = vcmp.ge.f32.partialorder %v629_v6, 0.0  ;;  %v729_v12 = vsel %vm696_vm2, %v625_v0, %v713_v4 }
 0x141   : > { %v732_v10 = vsel %vm699_vm3, %v627_v2, %v716_v7 }
 0x142   : > { %v632_v11 = vpop.f32.mrb[4].mxu1  ;;  %v733_v13 = vsel %vm700_vm4, %v629_v6, %v717_v8  ;;  %v748_v14 = vpack.c.bf16 %v732_v10, %v728_v9  ;;  %v2487_v10 = vstv %s1933_s22 }
 0x143   : > { %v633_v15 = vadd.f32 %v632_v11, %v2442_v5  ;;  %v634_v16 = vpop.f32.mrb[5].mxu1  ;;  %v749_v17 = vpack.c.bf16 %v733_v13, %v729_v12 }
 0x144   : > { %v635_v19 = vadd.f32 %v634_v16, %v2442_v5  ;;  %v636_v21 = vpop.f32.mrb[6].mxu1 }
 0x145   : > { %v720_v22 = vmul.f32 %v2433_v59, %v633_v15  ;;  %v637_v23 = vadd.f32 %v636_v21, %v2448_v18  ;;  %v638_v24 = vpop.f32.mrb[7].mxu1  ;;  %773 = vmatprep.subr.bf16.mxu0 %v749_v17  ;;  %vm703_vm5 = vcmp.ge.f32.partialorder %v633_v15, 0.0 }
 0x146   : > { %v721_v25 = vmul.f32 %v2433_v59, %v635_v19  ;;  %v639_v26 = vadd.f32 %v638_v24, %v2448_v18  ;;  %774 = vmatpush1.bf16.msra.mxu0 %v748_v14  ;;  %vm704_vm6 = vcmp.ge.f32.partialorder %v635_v19, 0.0 }
 0x147   : > { %vm707_vm7 = vcmp.ge.f32.partialorder %v637_v23, 0.0  ;;  %v724_v27 = vmul.f32 %v2433_v59, %v637_v23  ;;  %v736_v29 = vsel %vm703_vm5, %v633_v15, %v720_v22 }
 0x148   : > { %vm708_vm8 = vcmp.ge.f32.partialorder %v639_v26, 0.0  ;;  %v725_v28 = vmul.f32 %v2433_v59, %v639_v26  ;;  %v737_v31 = vsel %vm704_vm6, %v635_v19, %v721_v25 }
 0x149   : > { %v740_v30 = vsel %vm707_vm7, %v637_v23, %v724_v27 }
 0x14a   : > { %v741_v32 = vsel %vm708_vm8, %v639_v26, %v725_v28  ;;  %v752_v33 = vpack.c.bf16 %v740_v30, %v736_v29 }
 0x14b   : > { %v753_v34 = vpack.c.bf16 %v741_v32, %v737_v31 }
 0x14d   : > { %775 = vmatprep.subr.bf16.mxu0 %v753_v34 }
 0x14e   : > { %776 = vmatpush1.bf16.msra.mxu0 %v752_v33 }
 0x151   : > { %1929 = vmatmul.mubr.msk.bf16.vlgmr.msra.gmra.mrb[0].mxu0 %vm766_vm9, %v2167_v35 }
 0x152   : > { %815 = vmatprep.mubr.bf16.mxu0 %v2203_v20 }
 0x159   : > { %1930 = vmatmul.mubr.msk.bf16.gmra.mrb[4].mxu0 %vm766_vm9, %v2168_v36 }
 0x15a   : > { %989 = vmatprep.mubr.bf16.mxu0 %v2203_v20 }
 0x17a   : > { %v675_v37 = vpop.f32.mrb[8].mxu1 }
 0x17b   : > { %v676_v38 = vadd.f32 %v675_v37, %v2431_v57  ;;  %v677_v39 = vpop.f32.mrb[9].mxu1 }
 0x17c   : > { %v678_v40 = vadd.f32 %v677_v39, %v2431_v57  ;;  %v679_v41 = vpop.f32.mrb[10].mxu1  ;;  %v2169_v39 = vld [vmem:[%s2817_s5] sm:$0xff]  }
 0x17d   : > { %v714_v42 = vmul.f32 %v2433_v59, %v676_v38  ;;  %v680_v43 = vadd.f32 %v679_v41, %v2435_v60  ;;  %v681_v44 = vpop.f32.mrb[11].mxu1  ;;  %vm697_vm10 = vcmp.ge.f32.partialorder %v676_v38, 0.0 }
 0x17e   : > { %v715_v45 = vmul.f32 %v2433_v59, %v678_v40  ;;  %v682_v46 = vadd.f32 %v681_v44, %v2435_v60  ;;  %vm698_vm11 = vcmp.ge.f32.partialorder %v678_v40, 0.0 }
 0x17f   : > { %vm701_vm12 = vcmp.ge.f32.partialorder %v680_v43, 0.0  ;;  %v718_v47 = vmul.f32 %v2433_v59, %v680_v43  ;;  %v730_v49 = vsel %vm697_vm10, %v676_v38, %v714_v42 }
 0x180   : > { %vm702_vm13 = vcmp.ge.f32.partialorder %v682_v46, 0.0  ;;  %v719_v48 = vmul.f32 %v2433_v59, %v682_v46  ;;  %v731_v53 = vsel %vm698_vm11, %v678_v40, %v715_v45  ;;  %v2170_v40 = vld [vmem:[%s2817_s5 + $0x8] sm:$0xff]  }
 0x181   : > { %v734_v50 = vsel %vm701_vm12, %v680_v43, %v718_v47 }
 0x182   : > { %v750_v51 = vpack.c.bf16 %v734_v50, %v730_v49  ;;  %v685_v52 = vpop.f32.mrb[12].mxu1  ;;  %v735_v54 = vsel %vm702_vm13, %v682_v46, %v719_v48 }
 0x183   : > { %v686_v55 = vadd.f32 %v685_v52, %v2442_v5  ;;  %v687_v56 = vpop.f32.mrb[13].mxu1  ;;  %v751_v57 = vpack.c.bf16 %v735_v54, %v731_v53 }
 0x184   : > { %v688_v58 = vadd.f32 %v687_v56, %v2442_v5  ;;  %v689_v60 = vpop.f32.mrb[14].mxu1 }
 0x185   : > { %v722_v61 = vmul.f32 %v2433_v59, %v686_v55  ;;  %v690_v62 = vadd.f32 %v689_v60, %v2448_v18  ;;  %v691_v0 = vpop.f32.mrb[15].mxu1  ;;  %826 = vmatprep.subr.bf16.mxu1 %v751_v57  ;;  %vm705_vm14 = vcmp.ge.f32.partialorder %v686_v55, 0.0 }
 0x186   : > { %v723_v63 = vmul.f32 %v2433_v59, %v688_v58  ;;  %v692_v1 = vadd.f32 %v691_v0, %v2448_v18  ;;  %827 = vmatpush1.bf16.msra.mxu1 %v750_v51  ;;  %vm706_vm15 = vcmp.ge.f32.partialorder %v688_v58, 0.0 }
 0x187   : > { %vm709_vm0 = vcmp.ge.f32.partialorder %v690_v62, 0.0  ;;  %v726_v2 = vmul.f32 %v2433_v59, %v690_v62  ;;  %v738_v4 = vsel %vm705_vm14, %v686_v55, %v722_v61 }
 0x188   : > { %vm710_vm1 = vcmp.ge.f32.partialorder %v692_v1, 0.0  ;;  %v727_v3 = vmul.f32 %v2433_v59, %v692_v1  ;;  %v739_v7 = vsel %vm706_vm15, %v688_v58, %v723_v63 }
 0x189   : > { %v742_v5 = vsel %vm709_vm0, %v690_v62, %v726_v2 }
 0x18a   : > { %v754_v6 = vpack.c.bf16 %v742_v5, %v738_v4  ;;  %v743_v8 = vsel %vm710_vm1, %v692_v1, %v727_v3 }
 0x18b   : > { %v755_v9 = vpack.c.bf16 %v743_v8, %v739_v7 }
 0x18d   : > { %828 = vmatprep.subr.bf16.mxu1 %v755_v9 }
 0x18e   : > { %829 = vmatpush1.bf16.msra.mxu1 %v754_v6  ;;  %v2519_v6 = vstv %s1940_s27 }
 0x191   : > { %1931 = vmatmul.mubr.msk.bf16.vlgmr.msra.gmra.mrb[16].mxu1 %vm766_vm9, %v2167_v35 }
 0x192   : > { %868 = vmatprep.mubr.bf16.mxu1 %v2203_v20 }
 0x199   : > { %1932 = vmatmul.mubr.msk.bf16.gmra.mrb[20].mxu1 %vm766_vm9, %v2168_v36 }
 0x19a   : > { %1042 = vmatprep.mubr.bf16.mxu1 %v2203_v20 }
 0x224   : > { %v807_v59 = vpop.f32.mrb[0].mxu0 }
 0x225   : > { %v897_v11 = vmul.f32 %v2487_v10, %v807_v59  ;;  %v809_v12 = vpop.f32.mrb[1].mxu0  ;;  %vm880_vm2 = vcmp.ge.f32.partialorder %v807_v59, 0.0 }
 0x226   : > { %v898_v13 = vmul.f32 %v2487_v10, %v809_v12  ;;  %v811_v14 = vpop.f32.mrb[2].mxu0  ;;  %vm881_vm3 = vcmp.ge.f32.partialorder %v809_v12, 0.0 }
 0x227   : > { %vm884_vm4 = vcmp.ge.f32.partialorder %v811_v14, 0.0  ;;  %v901_v15 = vmul.f32 %v2487_v10, %v811_v14  ;;  %v813_v16 = vpop.f32.mrb[3].mxu0  ;;  %v913_v18 = vsel %vm880_vm2, %v807_v59, %v897_v11 }
 0x228   : > { %vm885_vm5 = vcmp.ge.f32.partialorder %v813_v16, 0.0  ;;  %v902_v17 = vmul.f32 %v2487_v10, %v813_v16  ;;  %v914_v21 = vsel %vm881_vm3, %v809_v12, %v898_v13 }
 0x229   : > { %v917_v19 = vsel %vm884_vm4, %v811_v14, %v901_v15 }
 0x22a   : > { %v933_v22 = vpack.c.bf16 %v917_v19, %v913_v18  ;;  %v918_v23 = vsel %vm885_vm5, %v813_v16, %v902_v17 }
 0x22b   : > { %v934_v24 = vpack.c.bf16 %v918_v23, %v914_v21 }
 0x22c   : > { %v817_v25 = vpop.f32.mrb[4].mxu0 }
 0x22d   : > { %v905_v26 = vmul.f32 %v2487_v10, %v817_v25  ;;  %v819_v27 = vpop.f32.mrb[5].mxu0  ;;  %957 = vmatprep.subr.bf16.mxu0 %v934_v24  ;;  %vm888_vm6 = vcmp.ge.f32.partialorder %v817_v25, 0.0 }
 0x22e   : > { %v906_v28 = vmul.f32 %v2487_v10, %v819_v27  ;;  %v821_v29 = vpop.f32.mrb[6].mxu0  ;;  %958 = vmatpush1.bf16.msra.mxu0 %v933_v22  ;;  %vm889_vm7 = vcmp.ge.f32.partialorder %v819_v27, 0.0 }
 0x22f   : > { %vm892_vm8 = vcmp.ge.f32.partialorder %v821_v29, 0.0  ;;  %v909_v30 = vmul.f32 %v2487_v10, %v821_v29  ;;  %v823_v31 = vpop.f32.mrb[7].mxu0  ;;  %v921_v33 = vsel %vm888_vm6, %v817_v25, %v905_v26 }
 0x230   : > { %vm893_vm10 = vcmp.ge.f32.partialorder %v823_v31, 0.0  ;;  %v910_v32 = vmul.f32 %v2487_v10, %v823_v31  ;;  %v922_v35 = vsel %vm889_vm7, %v819_v27, %v906_v28 }
 0x231   : > { %v925_v34 = vsel %vm892_vm8, %v821_v29, %v909_v30 }
 0x232   : > { %v937_v36 = vpack.c.bf16 %v925_v34, %v921_v33  ;;  %v926_v37 = vsel %vm893_vm10, %v823_v31, %v910_v32 }
 0x233   : > { %v938_v38 = vpack.c.bf16 %v926_v37, %v922_v35  ;;  %v2171_v35 = vld [vmem:[%s2818_s6] sm:$0xff]  }
 0x235   : > { %959 = vmatprep.subr.bf16.mxu0 %v938_v38 }
 0x236   : > { %960 = vmatpush1.bf16.msra.mxu0 %v937_v36  ;;  %v2172_v36 = vld [vmem:[%s2818_s6 + $0x8] sm:$0xff]  }
 0x239   : > { %1936 = vmatmul.mubr.msk.bf16.vlgmr.msra.gmra.mrb[8].mxu0 %vm766_vm9, %v2169_v39 }
 0x23a   : > { %999 = vmatprep.mubr.bf16.mxu0 %v2203_v20 }
 0x241   : > { %1937 = vmatmul.mubr.msk.bf16.gmra.mrb[12].mxu0 %vm766_vm9, %v2170_v40 }
 0x242   : > { %1173 = vmatprep.mubr.bf16.mxu0 %v2203_v20 }
 0x264   : > { %v860_v41 = vpop.f32.mrb[16].mxu1 }
 0x265   : > { %v899_v42 = vmul.f32 %v2487_v10, %v860_v41  ;;  %v862_v43 = vpop.f32.mrb[17].mxu1  ;;  %vm882_vm11 = vcmp.ge.f32.partialorder %v860_v41, 0.0 }
 0x266   : > { %v900_v44 = vmul.f32 %v2487_v10, %v862_v43  ;;  %v864_v45 = vpop.f32.mrb[18].mxu1  ;;  %vm883_vm12 = vcmp.ge.f32.partialorder %v862_v43, 0.0 }
 0x267   : > { %vm886_vm13 = vcmp.ge.f32.partialorder %v864_v45, 0.0  ;;  %v903_v46 = vmul.f32 %v2487_v10, %v864_v45  ;;  %v866_v47 = vpop.f32.mrb[19].mxu1  ;;  %v915_v49 = vsel %vm882_vm11, %v860_v41, %v899_v42 }
 0x268   : > { %vm887_vm14 = vcmp.ge.f32.partialorder %v866_v47, 0.0  ;;  %v904_v48 = vmul.f32 %v2487_v10, %v866_v47  ;;  %v916_v51 = vsel %vm883_vm12, %v862_v43, %v900_v44 }
 0x269   : > { %v919_v50 = vsel %vm886_vm13, %v864_v45, %v903_v46 }
 0x26a   : > { %v935_v52 = vpack.c.bf16 %v919_v50, %v915_v49  ;;  %v920_v53 = vsel %vm887_vm14, %v866_v47, %v904_v48 }
 0x26b   : > { %v936_v54 = vpack.c.bf16 %v920_v53, %v916_v51 }
 0x26c   : > { %v870_v55 = vpop.f32.mrb[20].mxu1 }
 0x26d   : > { %v907_v56 = vmul.f32 %v2487_v10, %v870_v55  ;;  %v872_v57 = vpop.f32.mrb[21].mxu1  ;;  %1010 = vmatprep.subr.bf16.mxu1 %v936_v54  ;;  %vm890_vm15 = vcmp.ge.f32.partialorder %v870_v55, 0.0 }
 0x26e   : > { %v908_v58 = vmul.f32 %v2487_v10, %v872_v57  ;;  %v874_v60 = vpop.f32.mrb[22].mxu1  ;;  %1011 = vmatpush1.bf16.msra.mxu1 %v935_v52  ;;  %vm891_vm0 = vcmp.ge.f32.partialorder %v872_v57, 0.0 }
 0x26f   : > { %vm894_vm1 = vcmp.ge.f32.partialorder %v874_v60, 0.0  ;;  %v911_v61 = vmul.f32 %v2487_v10, %v874_v60  ;;  %v876_v62 = vpop.f32.mrb[23].mxu1  ;;  %v923_v63 = vsel %vm890_vm15, %v870_v55, %v907_v56 }
 0x270   : > { %vm895_vm2 = vcmp.ge.f32.partialorder %v876_v62, 0.0  ;;  %v912_v0 = vmul.f32 %v2487_v10, %v876_v62  ;;  %v924_v2 = vsel %vm891_vm0, %v872_v57, %v908_v58 }
 0x271   : > { %v927_v1 = vsel %vm894_vm1, %v874_v60, %v911_v61 }
 0x272   : > { %v939_v3 = vpack.c.bf16 %v927_v1, %v923_v63  ;;  %v928_v4 = vsel %vm895_vm2, %v876_v62, %v912_v0 }
 0x273   : > { %v940_v5 = vpack.c.bf16 %v928_v4, %v924_v2  ;;  %v2173_v2 = vld [vmem:[%s2819_s7] sm:$0xff]   ;;  %v2555_v4 = vstv %s1947_s16 }
 0x275   : > { %1012 = vmatprep.subr.bf16.mxu1 %v940_v5 }
 0x276   : > { %1013 = vmatpush1.bf16.msra.mxu1 %v939_v3  ;;  %v2174_v3 = vld [vmem:[%s2819_s7 + $0x8] sm:$0xff]  }
 0x279   : > { %1938 = vmatmul.mubr.msk.bf16.vlgmr.msra.gmra.mrb[24].mxu1 %vm766_vm9, %v2169_v39 }
 0x27a   : > { %1052 = vmatprep.mubr.bf16.mxu1 %v2203_v20 }
 0x281   : > { %1939 = vmatmul.mubr.msk.bf16.gmra.mrb[28].mxu1 %vm766_vm9, %v2170_v40 }
 0x282   : > { %1226 = vmatprep.mubr.bf16.mxu1 %v2203_v20 }
 0x30c   : > { %v991_v7 = vpop.f32.mrb[8].mxu0 }
 0x30d   : > { %v1081_v8 = vmul.f32 %v2519_v6, %v991_v7  ;;  %v993_v9 = vpop.f32.mrb[9].mxu0  ;;  %vm1064_vm3 = vcmp.ge.f32.partialorder %v991_v7, 0.0 }
 0x30e   : > { %v1082_v10 = vmul.f32 %v2519_v6, %v993_v9  ;;  %v995_v59 = vpop.f32.mrb[10].mxu0  ;;  %vm1065_vm4 = vcmp.ge.f32.partialorder %v993_v9, 0.0 }
 0x30f   : > { %vm1068_vm5 = vcmp.ge.f32.partialorder %v995_v59, 0.0  ;;  %v1085_v11 = vmul.f32 %v2519_v6, %v995_v59  ;;  %v997_v12 = vpop.f32.mrb[11].mxu0  ;;  %v1097_v14 = vsel %vm1064_vm3, %v991_v7, %v1081_v8 }
 0x310   : > { %vm1069_vm6 = vcmp.ge.f32.partialorder %v997_v12, 0.0  ;;  %v1086_v13 = vmul.f32 %v2519_v6, %v997_v12  ;;  %v1098_v16 = vsel %vm1065_vm4, %v993_v9, %v1082_v10 }
 0x311   : > { %v1101_v15 = vsel %vm1068_vm5, %v995_v59, %v1085_v11 }
 0x312   : > { %v1117_v17 = vpack.c.bf16 %v1101_v15, %v1097_v14  ;;  %v1102_v18 = vsel %vm1069_vm6, %v997_v12, %v1086_v13 }
 0x313   : > { %v1118_v19 = vpack.c.bf16 %v1102_v18, %v1098_v16 }
 0x314   : > { %v1001_v21 = vpop.f32.mrb[12].mxu0 }
 0x315   : > { %v1089_v22 = vmul.f32 %v2519_v6, %v1001_v21  ;;  %v1003_v23 = vpop.f32.mrb[13].mxu0  ;;  %1141 = vmatprep.subr.bf16.mxu0 %v1118_v19  ;;  %vm1072_vm7 = vcmp.ge.f32.partialorder %v1001_v21, 0.0 }
 0x316   : > { %v1090_v24 = vmul.f32 %v2519_v6, %v1003_v23  ;;  %v1005_v25 = vpop.f32.mrb[14].mxu0  ;;  %1142 = vmatpush1.bf16.msra.mxu0 %v1117_v17  ;;  %vm1073_vm8 = vcmp.ge.f32.partialorder %v1003_v23, 0.0 }
 0x317   : > { %vm1076_vm10 = vcmp.ge.f32.partialorder %v1005_v25, 0.0  ;;  %v1093_v26 = vmul.f32 %v2519_v6, %v1005_v25  ;;  %v1007_v27 = vpop.f32.mrb[15].mxu0  ;;  %v1105_v29 = vsel %vm1072_vm7, %v1001_v21, %v1089_v22 }
 0x318   : > { %vm1077_vm11 = vcmp.ge.f32.partialorder %v1007_v27, 0.0  ;;  %v1094_v28 = vmul.f32 %v2519_v6, %v1007_v27  ;;  %v1106_v31 = vsel %vm1073_vm8, %v1003_v23, %v1090_v24 }
 0x319   : > { %v1109_v30 = vsel %vm1076_vm10, %v1005_v25, %v1093_v26 }
 0x31a   : > { %v1121_v32 = vpack.c.bf16 %v1109_v30, %v1105_v29  ;;  %v1110_v33 = vsel %vm1077_vm11, %v1007_v27, %v1094_v28 }
 0x31b   : > { %v1122_v34 = vpack.c.bf16 %v1110_v33, %v1106_v31 }
 0x31d   : > { %1143 = vmatprep.subr.bf16.mxu0 %v1122_v34 }
 0x31e   : > { %1144 = vmatpush1.bf16.msra.mxu0 %v1121_v32 }
 0x31f   : > { %2059 = vmatprep.subr.bf16.mxu0 %v2173_v2 }
 0x321   : > { %1943 = vmatmul.mubr.msk.bf16.vlgmr.msra.gmra.mrb[16].mxu0 %vm766_vm9, %v2171_v35 }
 0x322   : > { %1183 = vmatprep.mubr.bf16.mxu0 %v2203_v20  ;;  %2060 = vmatpush3.bf16.msra.mxu0 %v2173_v2 }
 0x323   : > { %2061 = vmatprep.subr.bf16.mxu0 %v2174_v3 }
 0x326   : > { %2062 = vmatpush3.bf16.msra.mxu0 %v2174_v3 }
 0x329   : > { %1944 = vmatmul.mubr.msk.bf16.gmra.mrb[20].mxu0 %vm766_vm9, %v2172_v36 }
 0x34c   : > { %v1044_v37 = vpop.f32.mrb[24].mxu1 }
 0x34d   : > { %v1083_v38 = vmul.f32 %v2519_v6, %v1044_v37  ;;  %v1046_v39 = vpop.f32.mrb[25].mxu1  ;;  %vm1066_vm12 = vcmp.ge.f32.partialorder %v1044_v37, 0.0 }
 0x34e   : > { %v1084_v40 = vmul.f32 %v2519_v6, %v1046_v39  ;;  %v1048_v41 = vpop.f32.mrb[26].mxu1  ;;  %vm1067_vm13 = vcmp.ge.f32.partialorder %v1046_v39, 0.0 }
 0x34f   : > { %vm1070_vm14 = vcmp.ge.f32.partialorder %v1048_v41, 0.0  ;;  %v1087_v42 = vmul.f32 %v2519_v6, %v1048_v41  ;;  %v1050_v43 = vpop.f32.mrb[27].mxu1  ;;  %v1099_v45 = vsel %vm1066_vm12, %v1044_v37, %v1083_v38 }
 0x350   : > { %vm1071_vm15 = vcmp.ge.f32.partialorder %v1050_v43, 0.0  ;;  %v1088_v44 = vmul.f32 %v2519_v6, %v1050_v43  ;;  %v1100_v47 = vsel %vm1067_vm13, %v1046_v39, %v1084_v40 }
 0x351   : > { %v1103_v46 = vsel %vm1070_vm14, %v1048_v41, %v1087_v42 }
 0x352   : > { %v1119_v48 = vpack.c.bf16 %v1103_v46, %v1099_v45  ;;  %v1104_v49 = vsel %vm1071_vm15, %v1050_v43, %v1088_v44 }
 0x353   : > { %v1120_v50 = vpack.c.bf16 %v1104_v49, %v1100_v47 }
 0x354   : > { %v1054_v51 = vpop.f32.mrb[28].mxu1 }
 0x355   : > { %v1091_v52 = vmul.f32 %v2519_v6, %v1054_v51  ;;  %v1056_v53 = vpop.f32.mrb[29].mxu1  ;;  %1194 = vmatprep.subr.bf16.mxu1 %v1120_v50  ;;  %vm1074_vm0 = vcmp.ge.f32.partialorder %v1054_v51, 0.0 }
 0x356   : > { %v1092_v54 = vmul.f32 %v2519_v6, %v1056_v53  ;;  %v1058_v55 = vpop.f32.mrb[30].mxu1  ;;  %1195 = vmatpush1.bf16.msra.mxu1 %v1119_v48  ;;  %vm1075_vm1 = vcmp.ge.f32.partialorder %v1056_v53, 0.0 }
 0x357   : > { %vm1078_vm2 = vcmp.ge.f32.partialorder %v1058_v55, 0.0  ;;  %v1095_v56 = vmul.f32 %v2519_v6, %v1058_v55  ;;  %v1060_v57 = vpop.f32.mrb[31].mxu1  ;;  %v1107_v60 = vsel %vm1074_vm0, %v1054_v51, %v1091_v52 }
 0x358   : > { %vm1079_vm3 = vcmp.ge.f32.partialorder %v1060_v57, 0.0  ;;  %v1096_v58 = vmul.f32 %v2519_v6, %v1060_v57  ;;  %v1108_v62 = vsel %vm1075_vm1, %v1056_v53, %v1092_v54 }
 0x359   : > { %v1111_v61 = vsel %vm1078_vm2, %v1058_v55, %v1095_v56 }
 0x35a   : > { %v1123_v0 = vpack.c.bf16 %v1111_v61, %v1107_v60  ;;  %v1112_v63 = vsel %vm1079_vm3, %v1060_v57, %v1096_v58 }
 0x35b   : > { %v1124_v1 = vpack.c.bf16 %v1112_v63, %v1108_v62 }
 0x35d   : > { %1196 = vmatprep.subr.bf16.mxu1 %v1124_v1 }
 0x35e   : > { %1197 = vmatpush1.bf16.msra.mxu1 %v1123_v0 }
 0x361   : > { %1945 = vmatmul.mubr.msk.bf16.vlgmr.msra.gmra.mrb[32].mxu1 %vm766_vm9, %v2171_v35 }
 0x362   : > { %1236 = vmatprep.mubr.bf16.mxu1 %v2203_v20 }
 0x369   : > { %1946 = vmatmul.mubr.msk.bf16.gmra.mrb[36].mxu1 %vm766_vm9, %v2172_v36 }
 0x3f4   : > { %v1175_v5 = vpop.f32.mrb[16].mxu0 }
 0x3f5   : > { %v1265_v20 = vmul.f32 %v2555_v4, %v1175_v5  ;;  %v1177_v6 = vpop.f32.mrb[17].mxu0  ;;  %vm1248_vm4 = vcmp.ge.f32.partialorder %v1175_v5, 0.0 }
 0x3f6   : > { %v1266_v7 = vmul.f32 %v2555_v4, %v1177_v6  ;;  %v1179_v8 = vpop.f32.mrb[18].mxu0  ;;  %vm1249_vm5 = vcmp.ge.f32.partialorder %v1177_v6, 0.0 }
 0x3f7   : > { %vm1252_vm6 = vcmp.ge.f32.partialorder %v1179_v8, 0.0  ;;  %v1269_v9 = vmul.f32 %v2555_v4, %v1179_v8  ;;  %v1181_v10 = vpop.f32.mrb[19].mxu0  ;;  %v1281_v11 = vsel %vm1248_vm4, %v1175_v5, %v1265_v20 }
 0x3f8   : > { %vm1253_vm7 = vcmp.ge.f32.partialorder %v1181_v10, 0.0  ;;  %v1270_v59 = vmul.f32 %v2555_v4, %v1181_v10  ;;  %v1282_v13 = vsel %vm1249_vm5, %v1177_v6, %v1266_v7  ;;  %vm1777_vm5 = vcmask 64512  }
 0x3f9   : > { %v1285_v12 = vsel %vm1252_vm6, %v1179_v8, %v1269_v9 }
 0x3fa   : > { %v1286_v14 = vsel %vm1253_vm7, %v1181_v10, %v1270_v59  ;;  %v1297_v15 = vpack.c.bf16 %v1285_v12, %v1281_v11 }
 0x3fb   : > { %v1298_v16 = vpack.c.bf16 %v1286_v14, %v1282_v13 }
 0x3fc   : > { %v1185_v17 = vpop.f32.mrb[20].mxu0  ;;  %1316 = vxpose.xlu0.c.b16.start [1/2] (short) %v1297_v15, 128 }
 0x3fd   : > { %v1273_v18 = vmul.f32 %v2555_v4, %v1185_v17  ;;  %1332 = vxpose.xlu1.c.b16.start [1/2] (short) %v1298_v16, 128  ;;  %v1187_v19 = vpop.f32.mrb[21].mxu0  ;;  %vm1256_vm8 = vcmp.ge.f32.partialorder %v1185_v17, 0.0 }
 0x3fe   : > { %v1274_v21 = vmul.f32 %v2555_v4, %v1187_v19  ;;  %v1189_v22 = vpop.f32.mrb[22].mxu0  ;;  %vm1257_vm10 = vcmp.ge.f32.partialorder %v1187_v19, 0.0 }
 0x3ff   : > { %vm1260_vm11 = vcmp.ge.f32.partialorder %v1189_v22, 0.0  ;;  %v1277_v23 = vmul.f32 %v2555_v4, %v1189_v22  ;;  %v1191_v24 = vpop.f32.mrb[23].mxu0  ;;  %v1289_v26 = vsel %vm1256_vm8, %v1185_v17, %v1273_v18 }
 0x400   : > { %vm1261_vm12 = vcmp.ge.f32.partialorder %v1191_v24, 0.0  ;;  %v1278_v25 = vmul.f32 %v2555_v4, %v1191_v24  ;;  %v1290_v28 = vsel %vm1257_vm10, %v1187_v19, %v1274_v21 }
 0x401   : > { %v1293_v27 = vsel %vm1260_vm11, %v1189_v22, %v1277_v23 }
 0x402   : > { %v1301_v29 = vpack.c.bf16 %v1293_v27, %v1289_v26  ;;  %v1294_v30 = vsel %vm1261_vm12, %v1191_v24, %v1278_v25 }
 0x403   : > { %v1302_v31 = vpack.c.bf16 %v1294_v30, %v1290_v28  ;;  %v2608_v28 = vld [vmem:[%s2820_s8] ss:$0 sm:$0xff] }
 0x404   : > { %1317 = vxpose.xlu0.c.b16.end [2/2] (short) %v1301_v29, 128 }
 0x405   : > { %1333 = vxpose.xlu1.c.b16.end [2/2] (short) %v1302_v31, 128 }
 0x434   : > { %v1228_v32 = vpop.f32.mrb[32].mxu1 }
 0x435   : > { %v1267_v33 = vmul.f32 %v2555_v4, %v1228_v32  ;;  %v1230_v34 = vpop.f32.mrb[33].mxu1  ;;  %vm1250_vm13 = vcmp.ge.f32.partialorder %v1228_v32, 0.0 }
 0x436   : > { %v1268_v35 = vmul.f32 %v2555_v4, %v1230_v34  ;;  %v1232_v36 = vpop.f32.mrb[34].mxu1  ;;  %vm1251_vm14 = vcmp.ge.f32.partialorder %v1230_v34, 0.0 }
 0x437   : > { %vm1254_vm15 = vcmp.ge.f32.partialorder %v1232_v36, 0.0  ;;  %v1271_v37 = vmul.f32 %v2555_v4, %v1232_v36  ;;  %v1234_v38 = vpop.f32.mrb[35].mxu1  ;;  %v1283_v40 = vsel %vm1250_vm13, %v1228_v32, %v1267_v33 }
 0x438   : > { %vm1255_vm0 = vcmp.ge.f32.partialorder %v1234_v38, 0.0  ;;  %v1272_v39 = vmul.f32 %v2555_v4, %v1234_v38  ;;  %v1284_v42 = vsel %vm1251_vm14, %v1230_v34, %v1268_v35 }
 0x439   : > { %v1287_v41 = vsel %vm1254_vm15, %v1232_v36, %v1271_v37 }
 0x43a   : > { %v1288_v43 = vsel %vm1255_vm0, %v1234_v38, %v1272_v39  ;;  %v1299_v44 = vpack.c.bf16 %v1287_v41, %v1283_v40 }
 0x43b   : > { %v1300_v45 = vpack.c.bf16 %v1288_v43, %v1284_v42 }
 0x43c   : > { %v1238_v46 = vpop.f32.mrb[36].mxu1  ;;  %1348 = vxpose.xlu0.c.b16.start [1/2] (short) %v1299_v44, 128 }
 0x43d   : > { %v1275_v47 = vmul.f32 %v2555_v4, %v1238_v46  ;;  %v1240_v48 = vpop.f32.mrb[37].mxu1  ;;  %1364 = vxpose.xlu1.c.b16.start [1/2] (short) %v1300_v45, 128  ;;  %vm1258_vm1 = vcmp.ge.f32.partialorder %v1238_v46, 0.0 }
 0x43e   : > { %v1276_v49 = vmul.f32 %v2555_v4, %v1240_v48  ;;  %v1242_v50 = vpop.f32.mrb[38].mxu1  ;;  %vm1259_vm2 = vcmp.ge.f32.partialorder %v1240_v48, 0.0 }
 0x43f   : > { %vm1262_vm3 = vcmp.ge.f32.partialorder %v1242_v50, 0.0  ;;  %v1279_v51 = vmul.f32 %v2555_v4, %v1242_v50  ;;  %v1244_v52 = vpop.f32.mrb[39].mxu1  ;;  %v1291_v54 = vsel %vm1258_vm1, %v1238_v46, %v1275_v47 }
 0x440   : > { %vm1263_vm4 = vcmp.ge.f32.partialorder %v1244_v52, 0.0  ;;  %v1280_v53 = vmul.f32 %v2555_v4, %v1244_v52  ;;  %v1292_v56 = vsel %vm1259_vm2, %v1240_v48, %v1276_v49 }
 0x441   : > { %v1295_v55 = vsel %vm1262_vm3, %v1242_v50, %v1279_v51 }
 0x442   : > { %v1303_v57 = vpack.c.bf16 %v1295_v55, %v1291_v54  ;;  %v1296_v58 = vsel %vm1263_vm4, %v1244_v52, %v1280_v53 }
 0x443   : > { %v1304_v60 = vpack.c.bf16 %v1296_v58, %v1292_v56 }
 0x444   : > { %1349 = vxpose.xlu0.c.b16.end [2/2] (short) %v1303_v57, 128 }
 0x445   : > { %1365 = vxpose.xlu1.c.b16.end [2/2] (short) %v1304_v60, 128 }
 0x466   : > { %v1324_v61 = vpop.trf.xlu0 }
 0x467   : > { %2063 = vmatprep.mubr.msk.bf16.mxu0 %vm766_vm9, %v1324_v61  ;;  %v1340_v1 = vpop.trf.xlu1 }
 0x46a   : > { %v1325_v62 = vpop.trf.xlu0 }
 0x46b   : > { %2064 = vmatmul.mubr.msk.bf16.vlgmr.msra.gmra.mrb[24].mxu0 %vm766_vm9, %v1325_v62  ;;  %v1341_v4 = vpop.trf.xlu1 }
 0x46e   : > { %v1326_v0 = vpop.trf.xlu0 }
 0x46f   : > { %2067 = vmatprep.mubr.msk.bf16.mxu0 %vm766_vm9, %v1326_v0  ;;  %v1342_v20 = vpop.trf.xlu1 }
 0x472   : > { %v1327_v63 = vpop.trf.xlu0 }
 0x473   : > { %2068 = vmatmul.mubr.msk.bf16.gmra.mrb[28].mxu0 %vm766_vm9, %v1327_v63  ;;  %v1343_v7 = vpop.trf.xlu1 }
 0x476   : > { %v1328_v2 = vpop.trf.xlu0 }
 0x477   : > { %2071 = vmatprep.mubr.msk.bf16.mxu0 %vm766_vm9, %v1328_v2  ;;  %v1344_v8 = vpop.trf.xlu1 }
 0x47a   : > { %v1329_v3 = vpop.trf.xlu0 }
 0x47b   : > { %2072 = vmatmul.mubr.msk.bf16.gmra.mrb[32].mxu0 %vm766_vm9, %v1329_v3  ;;  %v1345_v9 = vpop.trf.xlu1 }
 0x47e   : > { %v1330_v5 = vpop.trf.xlu0 }
 0x47f   : > { %2075 = vmatprep.mubr.msk.bf16.mxu0 %vm766_vm9, %v1330_v5  ;;  %v1346_v10 = vpop.trf.xlu1 }
 0x482   : > { %v1331_v6 = vpop.trf.xlu0 }
 0x483   : > { %2076 = vmatmul.mubr.msk.bf16.gmra.mrb[36].mxu0 %vm766_vm9, %v1331_v6  ;;  %v1347_v59 = vpop.trf.xlu1 }
 0x484   : > { %2079 = vmatprep.mubr.msk.bf16.mxu0 %vm766_vm9, %v1340_v1 }
 0x48b   : > { %2080 = vmatmul.mubr.msk.bf16.gmra.mrb[40].mxu0 %vm766_vm9, %v1341_v4 }
 0x48c   : > { %2083 = vmatprep.mubr.msk.bf16.mxu0 %vm766_vm9, %v1342_v20 }
 0x493   : > { %2084 = vmatmul.mubr.msk.bf16.gmra.mrb[44].mxu0 %vm766_vm9, %v1343_v7 }
 0x494   : > { %2087 = vmatprep.mubr.msk.bf16.mxu0 %vm766_vm9, %v1344_v8 }
 0x49b   : > { %2088 = vmatmul.mubr.msk.bf16.gmra.mrb[48].mxu0 %vm766_vm9, %v1345_v9 }
 0x49c   : > { %2091 = vmatprep.mubr.msk.bf16.mxu0 %vm766_vm9, %v1346_v10 }
 0x4a3   : > { %2092 = vmatmul.mubr.msk.bf16.gmra.mrb[52].mxu0 %vm766_vm9, %v1347_v59 }
 0x4a6   : > { %v1356_v11 = vpop.trf.xlu0 }
 0x4a7   : > { %2095 = vmatprep.mubr.msk.bf16.mxu0 %vm766_vm9, %v1356_v11  ;;  %v1372_v15 = vpop.trf.xlu1 }
 0x4aa   : > { %v1357_v12 = vpop.trf.xlu0 }
 0x4ab   : > { %2096 = vmatmul.mubr.msk.bf16.gmra.mrb[56].mxu0 %vm766_vm9, %v1357_v12  ;;  %v1373_v18 = vpop.trf.xlu1 }
 0x4ae   : > { %v1358_v13 = vpop.trf.xlu0 }
 0x4af   : > { %2099 = vmatprep.mubr.msk.bf16.mxu0 %vm766_vm9, %v1358_v13  ;;  %v1374_v21 = vpop.trf.xlu1 }
 0x4b2   : > { %v1359_v14 = vpop.trf.xlu0 }
 0x4b3   : > { %2100 = vmatmul.mubr.msk.bf16.gmra.mrb[60].mxu0 %vm766_vm9, %v1359_v14  ;;  %v1375_v23 = vpop.trf.xlu1 }
 0x4b6   : > { %v1360_v16 = vpop.trf.xlu0 }
 0x4b7   : > { %2103 = vmatprep.mubr.msk.bf16.mxu0 %vm766_vm9, %v1360_v16  ;;  %v1376_v24 = vpop.trf.xlu1 }
 0x4ba   : > { %v1361_v17 = vpop.trf.xlu0 }
 0x4bb   : > { %2104 = vmatmul.mubr.msk.bf16.gmra.mrb[64].mxu0 %vm766_vm9, %v1361_v17  ;;  %v1377_v25 = vpop.trf.xlu1 }
 0x4be   : > { %v1362_v19 = vpop.trf.xlu0 }
 0x4bf   : > { %2107 = vmatprep.mubr.msk.bf16.mxu0 %vm766_vm9, %v1362_v19  ;;  %v1378_v26 = vpop.trf.xlu1 }
 0x4c2   : > { %v1363_v22 = vpop.trf.xlu0 }
 0x4c3   : > { %2108 = vmatmul.mubr.msk.bf16.gmra.mrb[68].mxu0 %vm766_vm9, %v1363_v22  ;;  %v1379_v27 = vpop.trf.xlu1 }
 0x4c4   : > { %2111 = vmatprep.mubr.msk.bf16.mxu0 %vm766_vm9, %v1372_v15 }
 0x4cb   : > { %2112 = vmatmul.mubr.msk.bf16.gmra.mrb[72].mxu0 %vm766_vm9, %v1373_v18 }
 0x4cc   : > { %2115 = vmatprep.mubr.msk.bf16.mxu0 %vm766_vm9, %v1374_v21 }
 0x4d3   : > { %2116 = vmatmul.mubr.msk.bf16.gmra.mrb[76].mxu0 %vm766_vm9, %v1375_v23 }
 0x4d4   : > { %2119 = vmatprep.mubr.msk.bf16.mxu0 %vm766_vm9, %v1376_v24 }
 0x4db   : > { %2120 = vmatmul.mubr.msk.bf16.gmra.mrb[80].mxu0 %vm766_vm9, %v1377_v25 }
 0x4dc   : > { %2123 = vmatprep.mubr.msk.bf16.mxu0 %vm766_vm9, %v1378_v26 }
 0x4e3   : > { %2124 = vmatmul.mubr.msk.bf16.gmra.mrb[84].mxu0 %vm766_vm9, %v1379_v27 }
 0x53e   : > { %v2065_v29 = vpop.f32.mrb[24].mxu0 }
 0x53f   : > { %v1531_v30 = vadd.f32 %v2065_v29, %v2608_v28  ;;  %v1522_v31 = vpop.f32.mrb[25].mxu0 }
 0x540   : > { %v1523_v32 = vadd.f32 %v2608_v28, %v1522_v31  ;;  %v2066_v33 = vpop.f32.mrb[26].mxu0 }
 0x541   : > { %1780 = vst.msk [vmem:[%s2615_s23 + $0x10] sm:$0xff] %vm1777_vm5, %v1531_v30  ;;  %v1534_v34 = vadd.f32 %v2066_v33, %v2608_v28  ;;  %v1525_v35 = vpop.f32.mrb[27].mxu0 }
 0x542   : > { %1778 = vst.msk [vmem:[%s2615_s23] sm:$0xff] %vm1777_vm5, %v1523_v32  ;;  %v1526_v36 = vadd.f32 %v2608_v28, %v1525_v35 }
 0x543   : > { %1781 = vst.msk [vmem:[%s2615_s23 + $0x18] sm:$0xff] %vm1777_vm5, %v1534_v34 }
 0x544   : > { %1779 = vst.msk [vmem:[%s2615_s23 + $0x8] sm:$0xff] %vm1777_vm5, %v1526_v36 }
 0x546   : > { %v2069_v37 = vpop.f32.mrb[28].mxu0 }
 0x547   : > { %v1547_v38 = vadd.f32 %v2069_v37, %v2608_v28  ;;  %v1538_v39 = vpop.f32.mrb[29].mxu0 }
 0x548   : > { %v1539_v40 = vadd.f32 %v2608_v28, %v1538_v39  ;;  %v2070_v41 = vpop.f32.mrb[30].mxu0 }
 0x549   : > { %1784 = vst.msk [vmem:[%s2615_s23 + $0x30] sm:$0xff] %vm1777_vm5, %v1547_v38  ;;  %v1550_v42 = vadd.f32 %v2070_v41, %v2608_v28  ;;  %v1541_v43 = vpop.f32.mrb[31].mxu0 }
 0x54a   : > { %1782 = vst.msk [vmem:[%s2615_s23 + $0x20] sm:$0xff] %vm1777_vm5, %v1539_v40  ;;  %v1542_v44 = vadd.f32 %v2608_v28, %v1541_v43 }
 0x54b   : > { %1785 = vst.msk [vmem:[%s2615_s23 + $0x38] sm:$0xff] %vm1777_vm5, %v1550_v42 }
 0x54c   : > { %1783 = vst.msk [vmem:[%s2615_s23 + $0x28] sm:$0xff] %vm1777_vm5, %v1542_v44 }
 0x54e   : > { %v2073_v45 = vpop.f32.mrb[32].mxu0 }
 0x54f   : > { %v1563_v46 = vadd.f32 %v2073_v45, %v2608_v28  ;;  %v1554_v47 = vpop.f32.mrb[33].mxu0 }
 0x550   : > { %v1555_v48 = vadd.f32 %v2608_v28, %v1554_v47  ;;  %v2074_v49 = vpop.f32.mrb[34].mxu0 }
 0x551   : > { %1788 = vst.msk [vmem:[%s2615_s23 + $0x50] sm:$0xff] %vm1777_vm5, %v1563_v46  ;;  %v1566_v50 = vadd.f32 %v2074_v49, %v2608_v28  ;;  %v1557_v51 = vpop.f32.mrb[35].mxu0 }
 0x552   : > { %1786 = vst.msk [vmem:[%s2615_s23 + $0x40] sm:$0xff] %vm1777_vm5, %v1555_v48  ;;  %v1558_v52 = vadd.f32 %v2608_v28, %v1557_v51 }
 0x553   : > { %1789 = vst.msk [vmem:[%s2615_s23 + $0x58] sm:$0xff] %vm1777_vm5, %v1566_v50 }
 0x554   : > { %1787 = vst.msk [vmem:[%s2615_s23 + $0x48] sm:$0xff] %vm1777_vm5, %v1558_v52 }
 0x556   : > { %v2077_v53 = vpop.f32.mrb[36].mxu0 }
 0x557   : > { %v1579_v54 = vadd.f32 %v2077_v53, %v2608_v28  ;;  %v1570_v55 = vpop.f32.mrb[37].mxu0 }
 0x558   : > { %v1571_v56 = vadd.f32 %v2608_v28, %v1570_v55  ;;  %v2078_v57 = vpop.f32.mrb[38].mxu0 }
 0x559   : > { %1792 = vst.msk [vmem:[%s2615_s23 + $0x70] sm:$0xff] %vm1777_vm5, %v1579_v54  ;;  %v1582_v58 = vadd.f32 %v2078_v57, %v2608_v28  ;;  %v1573_v60 = vpop.f32.mrb[39].mxu0 }
 0x55a   : > { %1790 = vst.msk [vmem:[%s2615_s23 + $0x60] sm:$0xff] %vm1777_vm5, %v1571_v56  ;;  %v1574_v61 = vadd.f32 %v2608_v28, %v1573_v60 }
 0x55b   : > { %1793 = vst.msk [vmem:[%s2615_s23 + $0x78] sm:$0xff] %vm1777_vm5, %v1582_v58 }
 0x55c   : > { %1791 = vst.msk [vmem:[%s2615_s23 + $0x68] sm:$0xff] %vm1777_vm5, %v1574_v61 }
 0x55e   : > { %v2081_v62 = vpop.f32.mrb[40].mxu0 }
 0x55f   : > { %v1595_v0 = vadd.f32 %v2081_v62, %v2608_v28  ;;  %v1586_v63 = vpop.f32.mrb[41].mxu0 }
 0x560   : > { %v1587_v1 = vadd.f32 %v2608_v28, %v1586_v63  ;;  %v2082_v2 = vpop.f32.mrb[42].mxu0 }
 0x561   : > { %1796 = vst.msk [vmem:[%s2615_s23 + $0x90] sm:$0xff] %vm1777_vm5, %v1595_v0  ;;  %v1598_v3 = vadd.f32 %v2082_v2, %v2608_v28  ;;  %v1589_v4 = vpop.f32.mrb[43].mxu0 }
 0x562   : > { %1794 = vst.msk [vmem:[%s2615_s23 + $0x80] sm:$0xff] %vm1777_vm5, %v1587_v1  ;;  %v1590_v5 = vadd.f32 %v2608_v28, %v1589_v4 }
 0x563   : > { %1797 = vst.msk [vmem:[%s2615_s23 + $0x98] sm:$0xff] %vm1777_vm5, %v1598_v3 }
 0x564   : > { %1795 = vst.msk [vmem:[%s2615_s23 + $0x88] sm:$0xff] %vm1777_vm5, %v1590_v5 }
 0x566   : > { %v2085_v20 = vpop.f32.mrb[44].mxu0 }
 0x567   : > { %v1611_v6 = vadd.f32 %v2085_v20, %v2608_v28  ;;  %v1602_v7 = vpop.f32.mrb[45].mxu0 }
 0x568   : > { %v1603_v8 = vadd.f32 %v2608_v28, %v1602_v7  ;;  %v2086_v9 = vpop.f32.mrb[46].mxu0 }
 0x569   : > { %1800 = vst.msk [vmem:[%s2615_s23 + $0xb0] sm:$0xff] %vm1777_vm5, %v1611_v6  ;;  %v1614_v10 = vadd.f32 %v2086_v9, %v2608_v28  ;;  %v1605_v59 = vpop.f32.mrb[47].mxu0 }
 0x56a   : > { %1798 = vst.msk [vmem:[%s2615_s23 + $0xa0] sm:$0xff] %vm1777_vm5, %v1603_v8  ;;  %v1606_v11 = vadd.f32 %v2608_v28, %v1605_v59 }
 0x56b   : > { %1801 = vst.msk [vmem:[%s2615_s23 + $0xb8] sm:$0xff] %vm1777_vm5, %v1614_v10 }
 0x56c   : > { %1799 = vst.msk [vmem:[%s2615_s23 + $0xa8] sm:$0xff] %vm1777_vm5, %v1606_v11 }
 0x56e   : > { %v2089_v12 = vpop.f32.mrb[48].mxu0 }
 0x56f   : > { %v1627_v13 = vadd.f32 %v2089_v12, %v2608_v28  ;;  %v1618_v14 = vpop.f32.mrb[49].mxu0 }
 0x570   : > { %v1619_v15 = vadd.f32 %v2608_v28, %v1618_v14  ;;  %v2090_v16 = vpop.f32.mrb[50].mxu0 }
 0x571   : > { %1804 = vst.msk [vmem:[%s2615_s23 + $0xd0] sm:$0xff] %vm1777_vm5, %v1627_v13  ;;  %v1630_v17 = vadd.f32 %v2090_v16, %v2608_v28  ;;  %v1621_v18 = vpop.f32.mrb[51].mxu0 }
 0x572   : > { %1802 = vst.msk [vmem:[%s2615_s23 + $0xc0] sm:$0xff] %vm1777_vm5, %v1619_v15  ;;  %v1622_v19 = vadd.f32 %v2608_v28, %v1621_v18 }
 0x573   : > { %1805 = vst.msk [vmem:[%s2615_s23 + $0xd8] sm:$0xff] %vm1777_vm5, %v1630_v17 }
 0x574   : > { %1803 = vst.msk [vmem:[%s2615_s23 + $0xc8] sm:$0xff] %vm1777_vm5, %v1622_v19 }
 0x576   : > { %v2093_v21 = vpop.f32.mrb[52].mxu0 }
 0x577   : > { %v1643_v22 = vadd.f32 %v2093_v21, %v2608_v28  ;;  %v1634_v23 = vpop.f32.mrb[53].mxu0 }
 0x578   : > { %v1635_v24 = vadd.f32 %v2608_v28, %v1634_v23  ;;  %v2094_v25 = vpop.f32.mrb[54].mxu0 }
 0x579   : > { %1808 = vst.msk [vmem:[%s2615_s23 + $0xf0] sm:$0xff] %vm1777_vm5, %v1643_v22  ;;  %v1646_v26 = vadd.f32 %v2094_v25, %v2608_v28  ;;  %v1637_v27 = vpop.f32.mrb[55].mxu0 }
 0x57a   : > { %1806 = vst.msk [vmem:[%s2615_s23 + $0xe0] sm:$0xff] %vm1777_vm5, %v1635_v24  ;;  %v1638_v29 = vadd.f32 %v2608_v28, %v1637_v27 }
 0x57b   : > { %1809 = vst.msk [vmem:[%s2615_s23 + $0xf8] sm:$0xff] %vm1777_vm5, %v1646_v26 }
 0x57c   : > { %1807 = vst.msk [vmem:[%s2615_s23 + $0xe8] sm:$0xff] %vm1777_vm5, %v1638_v29 }
 0x57e   : > { %v2097_v30 = vpop.f32.mrb[56].mxu0 }
 0x57f   : > { %v1659_v31 = vadd.f32 %v2097_v30, %v2608_v28  ;;  %v1650_v32 = vpop.f32.mrb[57].mxu0 }
 0x580   : > { %v1651_v33 = vadd.f32 %v2608_v28, %v1650_v32  ;;  %v2098_v34 = vpop.f32.mrb[58].mxu0 }
 0x581   : > { %1812 = vst.msk [vmem:[%s2615_s23 + $0x110] sm:$0xff] %vm1777_vm5, %v1659_v31  ;;  %v1662_v35 = vadd.f32 %v2098_v34, %v2608_v28  ;;  %v1653_v36 = vpop.f32.mrb[59].mxu0 }
 0x582   : > { %1810 = vst.msk [vmem:[%s2615_s23 + $0x100] sm:$0xff] %vm1777_vm5, %v1651_v33  ;;  %v1654_v37 = vadd.f32 %v2608_v28, %v1653_v36 }
 0x583   : > { %1813 = vst.msk [vmem:[%s2615_s23 + $0x118] sm:$0xff] %vm1777_vm5, %v1662_v35 }
 0x584   : > { %1811 = vst.msk [vmem:[%s2615_s23 + $0x108] sm:$0xff] %vm1777_vm5, %v1654_v37 }
 0x586   : > { %v2101_v38 = vpop.f32.mrb[60].mxu0 }
 0x587   : > { %v1675_v39 = vadd.f32 %v2101_v38, %v2608_v28  ;;  %v1666_v40 = vpop.f32.mrb[61].mxu0 }
 0x588   : > { %v1667_v41 = vadd.f32 %v2608_v28, %v1666_v40  ;;  %v2102_v42 = vpop.f32.mrb[62].mxu0 }
 0x589   : > { %1816 = vst.msk [vmem:[%s2615_s23 + $0x130] sm:$0xff] %vm1777_vm5, %v1675_v39  ;;  %v1678_v43 = vadd.f32 %v2102_v42, %v2608_v28  ;;  %v1669_v44 = vpop.f32.mrb[63].mxu0 }
 0x58a   : > { %1814 = vst.msk [vmem:[%s2615_s23 + $0x120] sm:$0xff] %vm1777_vm5, %v1667_v41  ;;  %v1670_v45 = vadd.f32 %v2608_v28, %v1669_v44 }
 0x58b   : > { %1817 = vst.msk [vmem:[%s2615_s23 + $0x138] sm:$0xff] %vm1777_vm5, %v1678_v43 }
 0x58c   : > { %1815 = vst.msk [vmem:[%s2615_s23 + $0x128] sm:$0xff] %vm1777_vm5, %v1670_v45 }
 0x58e   : > { %v2105_v46 = vpop.f32.mrb[64].mxu0 }
 0x58f   : > { %v1691_v47 = vadd.f32 %v2105_v46, %v2608_v28  ;;  %v1682_v48 = vpop.f32.mrb[65].mxu0 }
 0x590   : > { %v1683_v49 = vadd.f32 %v2608_v28, %v1682_v48  ;;  %v2106_v50 = vpop.f32.mrb[66].mxu0 }
 0x591   : > { %1820 = vst.msk [vmem:[%s2615_s23 + $0x150] sm:$0xff] %vm1777_vm5, %v1691_v47  ;;  %v1694_v51 = vadd.f32 %v2106_v50, %v2608_v28  ;;  %v1685_v52 = vpop.f32.mrb[67].mxu0 }
 0x592   : > { %1818 = vst.msk [vmem:[%s2615_s23 + $0x140] sm:$0xff] %vm1777_vm5, %v1683_v49  ;;  %v1686_v53 = vadd.f32 %v2608_v28, %v1685_v52 }
 0x593   : > { %1821 = vst.msk [vmem:[%s2615_s23 + $0x158] sm:$0xff] %vm1777_vm5, %v1694_v51 }
 0x594   : > { %1819 = vst.msk [vmem:[%s2615_s23 + $0x148] sm:$0xff] %vm1777_vm5, %v1686_v53 }
 0x596   : > { %v2109_v54 = vpop.f32.mrb[68].mxu0 }
 0x597   : > { %v1707_v55 = vadd.f32 %v2109_v54, %v2608_v28  ;;  %v1698_v56 = vpop.f32.mrb[69].mxu0 }
 0x598   : > { %v1699_v57 = vadd.f32 %v2608_v28, %v1698_v56  ;;  %v2110_v58 = vpop.f32.mrb[70].mxu0 }
 0x599   : > { %1824 = vst.msk [vmem:[%s2615_s23 + $0x170] sm:$0xff] %vm1777_vm5, %v1707_v55  ;;  %v1710_v60 = vadd.f32 %v2110_v58, %v2608_v28  ;;  %v1701_v61 = vpop.f32.mrb[71].mxu0 }
 0x59a   : > { %1822 = vst.msk [vmem:[%s2615_s23 + $0x160] sm:$0xff] %vm1777_vm5, %v1699_v57  ;;  %v1702_v62 = vadd.f32 %v2608_v28, %v1701_v61 }
 0x59b   : > { %1825 = vst.msk [vmem:[%s2615_s23 + $0x178] sm:$0xff] %vm1777_vm5, %v1710_v60 }
 0x59c   : > { %1823 = vst.msk [vmem:[%s2615_s23 + $0x168] sm:$0xff] %vm1777_vm5, %v1702_v62 }
 0x59e   : > { %v2113_v0 = vpop.f32.mrb[72].mxu0 }
 0x59f   : > { %v1723_v63 = vadd.f32 %v2113_v0, %v2608_v28  ;;  %v1714_v1 = vpop.f32.mrb[73].mxu0 }
 0x5a0   : > { %v1715_v2 = vadd.f32 %v2608_v28, %v1714_v1  ;;  %v2114_v3 = vpop.f32.mrb[74].mxu0 }
 0x5a1   : > { %1828 = vst.msk [vmem:[%s2615_s23 + $0x190] sm:$0xff] %vm1777_vm5, %v1723_v63  ;;  %v1726_v4 = vadd.f32 %v2114_v3, %v2608_v28  ;;  %v1717_v5 = vpop.f32.mrb[75].mxu0 }
 0x5a2   : > { %1826 = vst.msk [vmem:[%s2615_s23 + $0x180] sm:$0xff] %vm1777_vm5, %v1715_v2  ;;  %v1718_v20 = vadd.f32 %v2608_v28, %v1717_v5 }
 0x5a3   : > { %1829 = vst.msk [vmem:[%s2615_s23 + $0x198] sm:$0xff] %vm1777_vm5, %v1726_v4 }
 0x5a4   : > { %1827 = vst.msk [vmem:[%s2615_s23 + $0x188] sm:$0xff] %vm1777_vm5, %v1718_v20 }
 0x5a6   : > { %v2117_v6 = vpop.f32.mrb[76].mxu0 }
 0x5a7   : > { %v1739_v7 = vadd.f32 %v2117_v6, %v2608_v28  ;;  %v1730_v8 = vpop.f32.mrb[77].mxu0 }
 0x5a8   : > { %v1731_v9 = vadd.f32 %v2608_v28, %v1730_v8  ;;  %v2118_v10 = vpop.f32.mrb[78].mxu0 }
 0x5a9   : > { %1832 = vst.msk [vmem:[%s2615_s23 + $0x1b0] sm:$0xff] %vm1777_vm5, %v1739_v7  ;;  %v1742_v59 = vadd.f32 %v2118_v10, %v2608_v28  ;;  %v1733_v11 = vpop.f32.mrb[79].mxu0 }
 0x5aa   : > { %1830 = vst.msk [vmem:[%s2615_s23 + $0x1a0] sm:$0xff] %vm1777_vm5, %v1731_v9  ;;  %v1734_v12 = vadd.f32 %v2608_v28, %v1733_v11 }
 0x5ab   : > { %1833 = vst.msk [vmem:[%s2615_s23 + $0x1b8] sm:$0xff] %vm1777_vm5, %v1742_v59 }
 0x5ac   : > { %1831 = vst.msk [vmem:[%s2615_s23 + $0x1a8] sm:$0xff] %vm1777_vm5, %v1734_v12 }
 0x5ae   : > { %v2121_v13 = vpop.f32.mrb[80].mxu0 }
 0x5af   : > { %v1755_v14 = vadd.f32 %v2121_v13, %v2608_v28  ;;  %v1746_v15 = vpop.f32.mrb[81].mxu0 }
 0x5b0   : > { %v1747_v16 = vadd.f32 %v2608_v28, %v1746_v15  ;;  %v2122_v17 = vpop.f32.mrb[82].mxu0 }
 0x5b1   : > { %1836 = vst.msk [vmem:[%s2615_s23 + $0x1d0] sm:$0xff] %vm1777_vm5, %v1755_v14  ;;  %v1758_v18 = vadd.f32 %v2122_v17, %v2608_v28  ;;  %v1749_v19 = vpop.f32.mrb[83].mxu0 }
 0x5b2   : > { %1834 = vst.msk [vmem:[%s2615_s23 + $0x1c0] sm:$0xff] %vm1777_vm5, %v1747_v16  ;;  %v1750_v21 = vadd.f32 %v2608_v28, %v1749_v19 }
 0x5b3   : > { %1837 = vst.msk [vmem:[%s2615_s23 + $0x1d8] sm:$0xff] %vm1777_vm5, %v1758_v18 }
 0x5b4   : > { %1835 = vst.msk [vmem:[%s2615_s23 + $0x1c8] sm:$0xff] %vm1777_vm5, %v1750_v21 }
 0x5b6   : > { %v2125_v22 = vpop.f32.mrb[84].mxu0 }
 0x5b7   : > { %v1771_v23 = vadd.f32 %v2125_v22, %v2608_v28  ;;  %v1762_v24 = vpop.f32.mrb[85].mxu0 }
 0x5b8   : > { %v1763_v25 = vadd.f32 %v2608_v28, %v1762_v24  ;;  %v2126_v26 = vpop.f32.mrb[86].mxu0 }
 0x5b9   : > { %1840 = vst.msk [vmem:[%s2615_s23 + $0x1f0] sm:$0xff] %vm1777_vm5, %v1771_v23  ;;  %v1774_v27 = vadd.f32 %v2126_v26, %v2608_v28  ;;  %v1765_v29 = vpop.f32.mrb[87].mxu0 }
 0x5ba   : > { %1838 = vst.msk [vmem:[%s2615_s23 + $0x1e0] sm:$0xff] %vm1777_vm5, %v1763_v25  ;;  %v1766_v30 = vadd.f32 %v2608_v28, %v1765_v29 }
 0x5bb   : > { %1841 = vst.msk [vmem:[%s2615_s23 + $0x1f8] sm:$0xff] %vm1777_vm5, %v1774_v27 }
 0x5bc   : > { %1839 = vst.msk [vmem:[%s2615_s23 + $0x1e8] sm:$0xff] %vm1777_vm5, %v1766_v30 }
 0x5bd PF: > { %s20_s30 = sadd.s32 1, %s2200_s30  }
 0x5be   : > { %p17_p1 = scmp.ge.s32.totalorder %s20_s30, 4  }
 0x5c0   :  { %19 = sbr.rel (!%p17_p1) target bundleno = 1 (0x1), region = 91 }
 0x5c7   :  { %1864 = vsyncpa [#allocation3], 1 }
 0x5c8   :  { %1866 = vsyncpa [#allocation3 + $0x1], 1 }

</bundles_post_ra>
